<compile_context>
chip_gen: v5e
topology: v5e:2x2
jax: 0.10.0
libtpu: 0.0.40
codegen_flags: <defaults>
</compile_context>

<pallas_src>
import functools

import jax
import jax.numpy as jnp
import numpy as np
from jax.experimental import pallas as pl
from jax.experimental.pallas import tpu as pltpu


def linear_attention_kernel(x_ref, mask_ref, wqkv_ref, wout_ref, bout_ref,
                            g_ref, o_ref, *, heads, dim_head, eps,
                            matmul_dtype, approx_recip, batch_tile):
    """One batch tile per grid step.

    x_ref:    (Bt, C, N)          activations (N = H*W on the lane axis), f32
    mask_ref: (hidden, hidden)    block-diagonal per-head mask * (scale / N), f32
    wqkv_ref: (3*hidden, C)       1x1-conv QKV weight (no bias), matmul_dtype
    wout_ref: (C, hidden)         1x1-conv output weight, f32
    bout_ref: (C, 1)              output bias, f32
    g_ref:    (C, 1)              LayerNorm gain, f32
    o_ref:    (Bt, C, N)          output, f32
    """
    hidden = heads * dim_head
    c = x_ref.shape[1]
    n = x_ref.shape[2]
    md = matmul_dtype

    # Resident parameters: load once per grid step (shared across the tile).
    wqkv = wqkv_ref[...]                   # (3*hidden, C)
    wout = wout_ref[...]                   # (C, hidden) f32
    bias = bout_ref[...]                   # (C, 1) f32
    gain = g_ref[...]                      # (C, 1) f32
    mask = mask_ref[...]                   # (hidden, hidden) f32, has scale/n folded

    use_vpu_proj = c <= 8                  # tiny-K contraction -> VPU FMAs
    w_proj = wqkv.astype(jnp.float32) if use_vpu_proj else wqkv

    for bt in range(batch_tile):           # short, static unroll over the tile
        x = x_ref[bt]                      # (C, N) f32

        # ---- QKV projection (1x1 conv, no bias) --------------------------
        if use_vpu_proj:
            # K = C is tiny: broadcast-FMA on the VPU avoids MXU pad/drain.
            qkv = w_proj[:, 0:1] * x[0:1, :]
            for ci in range(1, c):
                qkv = qkv + w_proj[:, ci:ci + 1] * x[ci:ci + 1, :]
        else:
            qkv = jnp.dot(w_proj, x.astype(md),
                          preferred_element_type=jnp.float32)
        q = qkv[0 * hidden:1 * hidden]     # (hidden, N), row = h*D + d
        k = qkv[1 * hidden:2 * hidden]
        v = qkv[2 * hidden:3 * hidden]

        # ---- softmaxes (f32; EUP reciprocal for the denominators) --------
        # q: softmax over dim_head within each head (small sublane reduce).
        q3 = q.reshape(heads, dim_head, n)
        q_exp = jnp.exp(q3 - jnp.max(q3, axis=1, keepdims=True))
        q_soft = (q_exp * pl.reciprocal(jnp.sum(q_exp, axis=1, keepdims=True),
                                        approx=approx_recip)
                  ).reshape(hidden, n)
        # k: softmax over the spatial (lane) axis.
        k_exp = jnp.exp(k - jnp.max(k, axis=1, keepdims=True))
        k_soft = k_exp * pl.reciprocal(jnp.sum(k_exp, axis=1, keepdims=True),
                                       approx=approx_recip)

        # ---- linear attention, heads flattened ---------------------------
        # full_ctx[h*D+e, h'*D+d] = sum_n v[h*D+e, n] * k_soft[h'*D+d, n]
        full_ctx = jax.lax.dot_general(
            v.astype(md), k_soft.astype(md), (((1,), (1,)), ((), ())),
            preferred_element_type=jnp.float32)        # (hidden, hidden)
        # Block-diagonal mask kills cross-head terms and carries scale/n.
        # Fold W_out into the tiny context (linear ops commute -> exact).
        w_eff = jnp.dot(wout, full_ctx * mask,
                        preferred_element_type=jnp.float32)  # (C, hidden)

        # ---- fused output projection over N + bias ------------------------
        y = jnp.dot(w_eff.astype(md), q_soft.astype(md),
                    preferred_element_type=jnp.float32) + bias   # (C, N)

        # ---- channel LayerNorm (biased variance, per PyTorch module) ------
        mean = jnp.mean(y, axis=0, keepdims=True)
        var = jnp.mean(jnp.square(y - mean), axis=0, keepdims=True)
        o_ref[bt] = ((y - mean) * jax.lax.rsqrt(var + eps)
                     * gain).astype(o_ref.dtype)


def _tensorcores_per_device():
    """Best-effort TensorCore count per JAX device (width of 'parallel' grid)."""
    try:
        kind = jax.devices()[0].device_kind.lower()
    except Exception:
        return 1
    for tag in ("v4", "v5p", "v5 p", "v7"):   # megacore / dual-TC generations
        if tag in kind:
            return 2
    return 1


def _vmem_capacity_bytes():
    try:
        return int(pltpu.get_tpu_info().vmem_capacity_bytes)
    except Exception:
        return 64 << 20   # conservative (v7x per-TensorCore physical VMEM)


def linear_attention(x, w_qkv, w_out, b_out, g, *, heads, dim_head,
                     matmul_dtype=jnp.bfloat16, approx_recip=True,
                     batch_tile=None):
    """x: (B, C, H, W) float32. Returns (B, C, H, W) float32."""
    b, c, h, w = x.shape
    n = h * w
    hidden = heads * dim_head
    scale = dim_head ** (-0.5)
    eps = 1e-5 if x.dtype == jnp.float32 else 1e-3

    # Layout note: best performance when dim_head and C are multiples of the
    # sublane count (8 for f32, 16 for bf16 operands) and N = H*W is a
    # multiple of 128 (lane-dense stores). Correct either way since all
    # blocks span the full array dims.
    x_flat = x.reshape(b, c, n)
    b_out2 = b_out.reshape(c, 1).astype(jnp.float32)
    g2 = g.reshape(c, 1).astype(jnp.float32)
    w_out2 = w_out.astype(jnp.float32)
    # Cast the QKV weight once in the wrapper (resident; no per-step VPU cast).
    # When the tiny-K VPU projection path is taken (C <= 8) keep it f32.
    w_qkv2 = w_qkv.astype(matmul_dtype if c > 8 else jnp.float32)

    # Per-head block-diagonal mask with q's `* scale` and v's `/ n` folded in.
    idx = np.arange(hidden)
    mask_np = ((idx[:, None] // dim_head) == (idx[None, :] // dim_head))
    mask = jnp.asarray(mask_np.astype(np.float32) * (scale / n))

    # ---- batch tiling: fuse the batch on single-TC chips, keep the parallel
    # grid a multiple of the TC count on dual-TC chips. -----------------------
    if batch_tile is None:
        n_tc = _tensorcores_per_device()
        if b % n_tc == 0:
            batch_tile = min(max(b // n_tc, 1), 4)
            while b % batch_tile != 0:
                batch_tile -= 1
        else:
            batch_tile = 1
    if b % batch_tile != 0:
        raise ValueError(f"batch_tile={batch_tile} must divide batch={b}")
    grid = (b // batch_tile,)

    kernel = functools.partial(
        linear_attention_kernel, heads=heads, dim_head=dim_head, eps=eps,
        matmul_dtype=matmul_dtype, approx_recip=approx_recip,
        batch_tile=batch_tile)

    # ---- VMEM estimate: pipeline blocks double-buffered, resident weights
    # single-buffered, plus in-kernel temporaries. Only raise the scoped limit
    # when the estimate exceeds the smallest generation default (16 MiB). -----
    md_bytes = jnp.dtype(matmul_dtype).itemsize if c > 8 else 4
    blk = batch_tile * c * n * 4                                  # one x / y block
    wgt = (3 * hidden * c) * md_bytes + (c * hidden + 2 * c + hidden * hidden) * 4
    tmp = (8 * hidden * n + 3 * c * n) * 4                        # live temporaries
    est = 2 * (2 * blk) + wgt + tmp
    vmem_limit = None
    if est > (16 << 20):
        vmem_limit = min(int(est * 1.25), int(0.9 * _vmem_capacity_bytes()))

    # ---- advisory cost estimate for the XLA scheduler ----------------------
    flops = (2 * b * n * c * (3 * hidden)      # QKV projection
             + 2 * b * n * hidden * hidden     # context (v @ k^T)
             + 2 * b * c * hidden * hidden     # W_out fold into context
             + 2 * b * n * hidden * c)         # fused output projection
    transcendentals = 2 * b * hidden * n       # the two exp slabs
    bytes_accessed = (2 * b * c * n * 4
                      + (3 * hidden * c) * md_bytes
                      + (c * hidden + 2 * c + hidden * hidden) * 4)
    cost = pl.CostEstimate(flops=int(flops),
                           transcendentals=int(transcendentals),
                           bytes_accessed=int(bytes_accessed))

    out = pl.pallas_call(
        kernel,
        out_shape=jax.ShapeDtypeStruct((b, c, n), jnp.float32),
        grid=grid,
        in_specs=[
            pl.BlockSpec((batch_tile, c, n), lambda i: (i, 0, 0)),   # x tile
            pl.BlockSpec((hidden, hidden), lambda i: (0, 0)),        # mask (resident)
            pl.BlockSpec((3 * hidden, c), lambda i: (0, 0)),         # W_qkv (resident)
            pl.BlockSpec((c, hidden), lambda i: (0, 0)),             # W_out (resident)
            pl.BlockSpec((c, 1), lambda i: (0, 0)),                  # b_out (resident)
            pl.BlockSpec((c, 1), lambda i: (0, 0)),                  # gamma (resident)
        ],
        out_specs=pl.BlockSpec((batch_tile, c, n), lambda i: (i, 0, 0)),
        compiler_params=pltpu.CompilerParams(
            dimension_semantics=("parallel",),
            vmem_limit_bytes=vmem_limit),
        cost_estimate=cost,
    )(x_flat, mask, w_qkv2, w_out2, b_out2, g2)

    return out.reshape(b, c, h, w)


def linear_attention_ref(x, w_qkv, w_out, b_out, g, *, heads, dim_head):
    """Pure-JAX reference mirroring the PyTorch module."""
    b, c, h, w = x.shape
    n = h * w
    hidden = heads * dim_head
    scale = dim_head ** (-0.5)
    eps = 1e-5 if x.dtype == jnp.float32 else 1e-3

    x2 = x.reshape(b, c, n)
    qkv = jnp.einsum('oc,bcn->bon', w_qkv, x2)
    q, k, v = jnp.split(qkv, 3, axis=1)
    q = q.reshape(b, heads, dim_head, n)
    k = k.reshape(b, heads, dim_head, n)
    v = v.reshape(b, heads, dim_head, n)
    q = jax.nn.softmax(q, axis=-2) * scale
    k = jax.nn.softmax(k, axis=-1)
    v = v / n
    context = jnp.einsum('bhdn,bhen->bhde', k, v)
    out = jnp.einsum('bhde,bhdn->bhen', context, q)
    out = out.reshape(b, hidden, n)
    y = jnp.einsum('oc,bcn->bon', w_out, out) + b_out.reshape(1, c, 1)
    mean = jnp.mean(y, axis=1, keepdims=True)
    var = jnp.mean((y - mean) ** 2, axis=1, keepdims=True)
    y = (y - mean) * jax.lax.rsqrt(var + eps) * g.reshape(1, c, 1)
    return y.reshape(b, c, h, w)


if __name__ == "__main__":
    # Small shapes consistent with the module: dim=4, heads=4, dim_head=8.
    B, DIM, H, W = 2, 4, 16, 16
    HEADS, DIM_HEAD = 4, 8
    HIDDEN = HEADS * DIM_HEAD

    key = jax.random.PRNGKey(0)
    kx, kw1, kw2, kb = jax.random.split(key, 4)

    x = jax.random.normal(kx, (B, DIM, H, W), dtype=jnp.float32)

    # Deterministic parameter init (synthetic; Conv2d 1x1 weights squeezed to 2D).
    w_qkv = jax.random.normal(kw1, (3 * HIDDEN, DIM), dtype=jnp.float32) * 0.1
    w_out = jax.random.normal(kw2, (DIM, HIDDEN), dtype=jnp.float32) * 0.1
    b_out = jax.random.normal(kb, (DIM,), dtype=jnp.float32) * 0.1
    g = jnp.ones((DIM,), dtype=jnp.float32)   # LayerNorm gain (init = ones)

    y_ref = linear_attention_ref(x, w_qkv, w_out, b_out, g,
                                 heads=HEADS, dim_head=DIM_HEAD)

    # f32 MXU operands (reference-accuracy path). Tolerance accounts for the
    # EUP approximate reciprocal in the softmax denominators.
    y_f32 = linear_attention(x, w_qkv, w_out, b_out, g,
                             heads=HEADS, dim_head=DIM_HEAD,
                             matmul_dtype=jnp.float32)
    y_f32 = jax.block_until_ready(y_f32)
    np.testing.assert_allclose(np.asarray(y_f32), np.asarray(y_ref),
                               rtol=2e-3, atol=2e-3)

    # Default path: bf16 MXU operands / f32 accumulation on every generation.
    y_bf16 = linear_attention(x, w_qkv, w_out, b_out, g,
                              heads=HEADS, dim_head=DIM_HEAD)
    y_bf16 = jax.block_until_ready(y_bf16)
    np.testing.assert_allclose(np.asarray(y_bf16), np.asarray(y_ref),
                               rtol=2e-2, atol=2e-2)

    print("KERNEL_OK")
</pallas_src>

<mosaic_0001>
module attributes {stable_mosaic.version = 11 : i64} {
  func.func @linear_attention_kernel(%arg0: i32, %arg1: memref<2x4x256xf32, #tpu.memory_space<vmem>>, %arg2: memref<32x32xf32, #tpu.memory_space<vmem>>, %arg3: memref<96x4xf32, #tpu.memory_space<vmem>>, %arg4: memref<4x32xf32, #tpu.memory_space<vmem>>, %arg5: memref<4x1xf32, #tpu.memory_space<vmem>>, %arg6: memref<4x1xf32, #tpu.memory_space<vmem>>, %arg7: memref<2x4x256xf32, #tpu.memory_space<vmem>>) attributes {dimension_semantics = [#tpu.dimension_semantics<parallel>], iteration_bounds = array<i64: 1>, scalar_prefetch = 0 : i64, scratch_operands = 0 : i64, tpu.core_type = #tpu.core_type<tc>, window_params = [{transform_indices = @transform_0, window_bounds = array<i64: 2, 4, 256>}, {pipeline_mode = #tpu.pipeline_mode<synchronous>, transform_indices = @transform_1, window_bounds = array<i64: 32, 32>}, {pipeline_mode = #tpu.pipeline_mode<synchronous>, transform_indices = @transform_2, window_bounds = array<i64: 96, 4>}, {pipeline_mode = #tpu.pipeline_mode<synchronous>, transform_indices = @transform_3, window_bounds = array<i64: 4, 32>}, {pipeline_mode = #tpu.pipeline_mode<synchronous>, transform_indices = @transform_4, window_bounds = array<i64: 4, 1>}, {pipeline_mode = #tpu.pipeline_mode<synchronous>, transform_indices = @transform_5, window_bounds = array<i64: 4, 1>}, {transform_indices = @transform_6, window_bounds = array<i64: 2, 4, 256>}]} {
    %c0 = arith.constant 0 : index
    %c0_0 = arith.constant 0 : index
    %0 = vector.load %arg3[%c0, %c0_0] : memref<96x4xf32, #tpu.memory_space<vmem>>, vector<96x4xf32>
    %c0_1 = arith.constant 0 : index
    %c0_2 = arith.constant 0 : index
    %1 = vector.load %arg4[%c0_1, %c0_2] : memref<4x32xf32, #tpu.memory_space<vmem>>, vector<4x32xf32>
    %c0_3 = arith.constant 0 : index
    %c0_4 = arith.constant 0 : index
    %2 = vector.load %arg5[%c0_3, %c0_4] : memref<4x1xf32, #tpu.memory_space<vmem>>, vector<4x1xf32>
    %c0_5 = arith.constant 0 : index
    %c0_6 = arith.constant 0 : index
    %3 = vector.load %arg6[%c0_5, %c0_6] : memref<4x1xf32, #tpu.memory_space<vmem>>, vector<4x1xf32>
    %c0_7 = arith.constant 0 : index
    %c0_8 = arith.constant 0 : index
    %4 = vector.load %arg2[%c0_7, %c0_8] : memref<32x32xf32, #tpu.memory_space<vmem>>, vector<32x32xf32>
    %c0_9 = arith.constant 0 : index
    %c0_10 = arith.constant 0 : index
    %c0_11 = arith.constant 0 : index
    %5 = vector.load %arg1[%c0_9, %c0_10, %c0_11] : memref<2x4x256xf32, #tpu.memory_space<vmem>>, vector<1x4x256xf32>
    %6 = vector.shape_cast %5 : vector<1x4x256xf32> to vector<4x256xf32>
    %7 = vector.extract_strided_slice %0 {offsets = [0, 0], sizes = [96, 1], strides = [1, 1]} : vector<96x4xf32> to vector<96x1xf32>
    %8 = vector.extract_strided_slice %6 {offsets = [0, 0], sizes = [1, 256], strides = [1, 1]} : vector<4x256xf32> to vector<1x256xf32>
    %9 = vector.broadcast %7 : vector<96x1xf32> to vector<96x256xf32>
    %10 = vector.broadcast %8 : vector<1x256xf32> to vector<96x256xf32>
    %11 = arith.mulf %9, %10 : vector<96x256xf32>
    %12 = vector.extract_strided_slice %0 {offsets = [0, 1], sizes = [96, 1], strides = [1, 1]} : vector<96x4xf32> to vector<96x1xf32>
    %13 = vector.extract_strided_slice %6 {offsets = [1, 0], sizes = [1, 256], strides = [1, 1]} : vector<4x256xf32> to vector<1x256xf32>
    %14 = vector.broadcast %12 : vector<96x1xf32> to vector<96x256xf32>
    %15 = vector.broadcast %13 : vector<1x256xf32> to vector<96x256xf32>
    %16 = arith.mulf %14, %15 : vector<96x256xf32>
    %17 = arith.addf %11, %16 : vector<96x256xf32>
    %18 = vector.extract_strided_slice %0 {offsets = [0, 2], sizes = [96, 1], strides = [1, 1]} : vector<96x4xf32> to vector<96x1xf32>
    %19 = vector.extract_strided_slice %6 {offsets = [2, 0], sizes = [1, 256], strides = [1, 1]} : vector<4x256xf32> to vector<1x256xf32>
    %20 = vector.broadcast %18 : vector<96x1xf32> to vector<96x256xf32>
    %21 = vector.broadcast %19 : vector<1x256xf32> to vector<96x256xf32>
    %22 = arith.mulf %20, %21 : vector<96x256xf32>
    %23 = arith.addf %17, %22 : vector<96x256xf32>
    %24 = vector.extract_strided_slice %0 {offsets = [0, 3], sizes = [96, 1], strides = [1, 1]} : vector<96x4xf32> to vector<96x1xf32>
    %25 = vector.extract_strided_slice %6 {offsets = [3, 0], sizes = [1, 256], strides = [1, 1]} : vector<4x256xf32> to vector<1x256xf32>
    %26 = vector.broadcast %24 : vector<96x1xf32> to vector<96x256xf32>
    %27 = vector.broadcast %25 : vector<1x256xf32> to vector<96x256xf32>
    %28 = arith.mulf %26, %27 : vector<96x256xf32>
    %29 = arith.addf %23, %28 : vector<96x256xf32>
    %30 = vector.extract_strided_slice %29 {offsets = [0, 0], sizes = [32, 256], strides = [1, 1]} : vector<96x256xf32> to vector<32x256xf32>
    %31 = vector.extract_strided_slice %29 {offsets = [32, 0], sizes = [32, 256], strides = [1, 1]} : vector<96x256xf32> to vector<32x256xf32>
    %32 = vector.extract_strided_slice %29 {offsets = [64, 0], sizes = [32, 256], strides = [1, 1]} : vector<96x256xf32> to vector<32x256xf32>
    %33 = vector.shape_cast %30 : vector<32x256xf32> to vector<4x8x256xf32>
    %cst = arith.constant dense<0xFF800000> : vector<4x256xf32>
    %34 = vector.multi_reduction <maximumf>, %33, %cst [1] : vector<4x8x256xf32> to vector<4x256xf32>
    %35 = vector.shape_cast %34 : vector<4x256xf32> to vector<4x1x256xf32>
    %36 = vector.broadcast %35 : vector<4x1x256xf32> to vector<4x8x256xf32>
    %37 = arith.subf %33, %36 : vector<4x8x256xf32>
    %38 = math.exp %37 : vector<4x8x256xf32>
    %cst_12 = arith.constant dense<0.000000e+00> : vector<4x256xf32>
    %39 = vector.multi_reduction <add>, %38, %cst_12 [1] : vector<4x8x256xf32> to vector<4x256xf32>
    %40 = vector.shape_cast %39 : vector<4x256xf32> to vector<4x1x256xf32>
    %41 = tpu.reciprocal %40 {approx = true} : vector<4x1x256xf32> -> vector<4x1x256xf32>
    %42 = vector.broadcast %41 : vector<4x1x256xf32> to vector<4x8x256xf32>
    %43 = arith.mulf %38, %42 : vector<4x8x256xf32>
    %44 = vector.shape_cast %43 : vector<4x8x256xf32> to vector<32x256xf32>
    %cst_13 = arith.constant dense<0xFF800000> : vector<32xf32>
    %45 = vector.multi_reduction <maximumf>, %31, %cst_13 [1] : vector<32x256xf32> to vector<32xf32>
    %46 = vector.shape_cast %45 : vector<32xf32> to vector<32x1xf32>
    %47 = vector.broadcast %46 : vector<32x1xf32> to vector<32x256xf32>
    %48 = arith.subf %31, %47 : vector<32x256xf32>
    %49 = math.exp %48 : vector<32x256xf32>
    %cst_14 = arith.constant dense<0.000000e+00> : vector<32xf32>
    %50 = vector.multi_reduction <add>, %49, %cst_14 [1] : vector<32x256xf32> to vector<32xf32>
    %51 = vector.shape_cast %50 : vector<32xf32> to vector<32x1xf32>
    %52 = tpu.reciprocal %51 {approx = true} : vector<32x1xf32> -> vector<32x1xf32>
    %53 = vector.broadcast %52 : vector<32x1xf32> to vector<32x256xf32>
    %54 = arith.mulf %49, %53 : vector<32x256xf32>
    %cst_15 = arith.constant dense<0.000000e+00> : vector<32x32xf32>
    %55 = tpu.matmul %32, %54, %cst_15 {dimension_numbers = #tpu.dot_dimension_numbers<[1], [1], [0], [0], [0, 0, 1, 0], [], []>} : vector<32x256xf32>, vector<32x256xf32>, vector<32x32xf32> -> vector<32x32xf32>
    %56 = arith.mulf %55, %4 : vector<32x32xf32>
    %cst_16 = arith.constant dense<0.000000e+00> : vector<4x32xf32>
    %57 = tpu.matmul %1, %56, %cst_16 {dimension_numbers = #tpu.dot_dimension_numbers<[1], [0], [0], [1], [0, 0, 1, 1], [], []>} : vector<4x32xf32>, vector<32x32xf32>, vector<4x32xf32> -> vector<4x32xf32>
    %cst_17 = arith.constant dense<0.000000e+00> : vector<4x256xf32>
    %58 = tpu.matmul %57, %44, %cst_17 {dimension_numbers = #tpu.dot_dimension_numbers<[1], [0], [0], [1], [0, 0, 1, 1], [], []>} : vector<4x32xf32>, vector<32x256xf32>, vector<4x256xf32> -> vector<4x256xf32>
    %59 = vector.broadcast %2 : vector<4x1xf32> to vector<4x256xf32>
    %60 = arith.addf %58, %59 : vector<4x256xf32>
    %cst_18 = arith.constant dense<0.000000e+00> : vector<256xf32>
    %61 = vector.multi_reduction <add>, %60, %cst_18 [0] : vector<4x256xf32> to vector<256xf32>
    %62 = vector.shape_cast %61 : vector<256xf32> to vector<1x256xf32>
    %cst_19 = arith.constant 4.000000e+00 : f32
    %63 = vector.broadcast %cst_19 : f32 to vector<1x256xf32>
    %64 = arith.divf %62, %63 : vector<1x256xf32>
    %65 = vector.broadcast %64 : vector<1x256xf32> to vector<4x256xf32>
    %66 = arith.subf %60, %65 : vector<4x256xf32>
    %67 = arith.mulf %66, %66 : vector<4x256xf32>
    %cst_20 = arith.constant dense<0.000000e+00> : vector<256xf32>
    %68 = vector.multi_reduction <add>, %67, %cst_20 [0] : vector<4x256xf32> to vector<256xf32>
    %69 = vector.shape_cast %68 : vector<256xf32> to vector<1x256xf32>
    %cst_21 = arith.constant 4.000000e+00 : f32
    %70 = vector.broadcast %cst_21 : f32 to vector<1x256xf32>
    %71 = arith.divf %69, %70 : vector<1x256xf32>
    %72 = vector.broadcast %64 : vector<1x256xf32> to vector<4x256xf32>
    %73 = arith.subf %60, %72 : vector<4x256xf32>
    %cst_22 = arith.constant 9.99999974E-6 : f32
    %74 = vector.broadcast %cst_22 : f32 to vector<1x256xf32>
    %75 = arith.addf %71, %74 : vector<1x256xf32>
    %76 = math.rsqrt %75 : vector<1x256xf32>
    %77 = vector.broadcast %76 : vector<1x256xf32> to vector<4x256xf32>
    %78 = arith.mulf %73, %77 : vector<4x256xf32>
    %79 = vector.broadcast %3 : vector<4x1xf32> to vector<4x256xf32>
    %80 = arith.mulf %78, %79 : vector<4x256xf32>
    %c0_23 = arith.constant 0 : index
    %c0_24 = arith.constant 0 : index
    %c0_25 = arith.constant 0 : index
    %81 = vector.load %arg7[%c0_23, %c0_24, %c0_25] : memref<2x4x256xf32, #tpu.memory_space<vmem>>, vector<1x4x256xf32>
    %82 = vector.shape_cast %81 : vector<1x4x256xf32> to vector<4x256xf32>
    %83 = vector.shape_cast %80 : vector<4x256xf32> to vector<1x4x256xf32>
    tpu.vector_store %arg7[%c0_23, %c0_24, %c0_25], %83 {strides = array<i32>} : memref<2x4x256xf32, #tpu.memory_space<vmem>>, vector<1x4x256xf32>,
    %c1 = arith.constant 1 : index
    %c0_26 = arith.constant 0 : index
    %c0_27 = arith.constant 0 : index
    %84 = vector.load %arg1[%c1, %c0_26, %c0_27] : memref<2x4x256xf32, #tpu.memory_space<vmem>>, vector<1x4x256xf32>
    %85 = vector.shape_cast %84 : vector<1x4x256xf32> to vector<4x256xf32>
    %86 = vector.extract_strided_slice %0 {offsets = [0, 0], sizes = [96, 1], strides = [1, 1]} : vector<96x4xf32> to vector<96x1xf32>
    %87 = vector.extract_strided_slice %85 {offsets = [0, 0], sizes = [1, 256], strides = [1, 1]} : vector<4x256xf32> to vector<1x256xf32>
    %88 = vector.broadcast %86 : vector<96x1xf32> to vector<96x256xf32>
    %89 = vector.broadcast %87 : vector<1x256xf32> to vector<96x256xf32>
    %90 = arith.mulf %88, %89 : vector<96x256xf32>
    %91 = vector.extract_strided_slice %0 {offsets = [0, 1], sizes = [96, 1], strides = [1, 1]} : vector<96x4xf32> to vector<96x1xf32>
    %92 = vector.extract_strided_slice %85 {offsets = [1, 0], sizes = [1, 256], strides = [1, 1]} : vector<4x256xf32> to vector<1x256xf32>
    %93 = vector.broadcast %91 : vector<96x1xf32> to vector<96x256xf32>
    %94 = vector.broadcast %92 : vector<1x256xf32> to vector<96x256xf32>
    %95 = arith.mulf %93, %94 : vector<96x256xf32>
    %96 = arith.addf %90, %95 : vector<96x256xf32>
    %97 = vector.extract_strided_slice %0 {offsets = [0, 2], sizes = [96, 1], strides = [1, 1]} : vector<96x4xf32> to vector<96x1xf32>
    %98 = vector.extract_strided_slice %85 {offsets = [2, 0], sizes = [1, 256], strides = [1, 1]} : vector<4x256xf32> to vector<1x256xf32>
    %99 = vector.broadcast %97 : vector<96x1xf32> to vector<96x256xf32>
    %100 = vector.broadcast %98 : vector<1x256xf32> to vector<96x256xf32>
    %101 = arith.mulf %99, %100 : vector<96x256xf32>
    %102 = arith.addf %96, %101 : vector<96x256xf32>
    %103 = vector.extract_strided_slice %0 {offsets = [0, 3], sizes = [96, 1], strides = [1, 1]} : vector<96x4xf32> to vector<96x1xf32>
    %104 = vector.extract_strided_slice %85 {offsets = [3, 0], sizes = [1, 256], strides = [1, 1]} : vector<4x256xf32> to vector<1x256xf32>
    %105 = vector.broadcast %103 : vector<96x1xf32> to vector<96x256xf32>
    %106 = vector.broadcast %104 : vector<1x256xf32> to vector<96x256xf32>
    %107 = arith.mulf %105, %106 : vector<96x256xf32>
    %108 = arith.addf %102, %107 : vector<96x256xf32>
    %109 = vector.extract_strided_slice %108 {offsets = [0, 0], sizes = [32, 256], strides = [1, 1]} : vector<96x256xf32> to vector<32x256xf32>
    %110 = vector.extract_strided_slice %108 {offsets = [32, 0], sizes = [32, 256], strides = [1, 1]} : vector<96x256xf32> to vector<32x256xf32>
    %111 = vector.extract_strided_slice %108 {offsets = [64, 0], sizes = [32, 256], strides = [1, 1]} : vector<96x256xf32> to vector<32x256xf32>
    %112 = vector.shape_cast %109 : vector<32x256xf32> to vector<4x8x256xf32>
    %cst_28 = arith.constant dense<0xFF800000> : vector<4x256xf32>
    %113 = vector.multi_reduction <maximumf>, %112, %cst_28 [1] : vector<4x8x256xf32> to vector<4x256xf32>
    %114 = vector.shape_cast %113 : vector<4x256xf32> to vector<4x1x256xf32>
    %115 = vector.broadcast %114 : vector<4x1x256xf32> to vector<4x8x256xf32>
    %116 = arith.subf %112, %115 : vector<4x8x256xf32>
    %117 = math.exp %116 : vector<4x8x256xf32>
    %cst_29 = arith.constant dense<0.000000e+00> : vector<4x256xf32>
    %118 = vector.multi_reduction <add>, %117, %cst_29 [1] : vector<4x8x256xf32> to vector<4x256xf32>
    %119 = vector.shape_cast %118 : vector<4x256xf32> to vector<4x1x256xf32>
    %120 = tpu.reciprocal %119 {approx = true} : vector<4x1x256xf32> -> vector<4x1x256xf32>
    %121 = vector.broadcast %120 : vector<4x1x256xf32> to vector<4x8x256xf32>
    %122 = arith.mulf %117, %121 : vector<4x8x256xf32>
    %123 = vector.shape_cast %122 : vector<4x8x256xf32> to vector<32x256xf32>
    %cst_30 = arith.constant dense<0xFF800000> : vector<32xf32>
    %124 = vector.multi_reduction <maximumf>, %110, %cst_30 [1] : vector<32x256xf32> to vector<32xf32>
    %125 = vector.shape_cast %124 : vector<32xf32> to vector<32x1xf32>
    %126 = vector.broadcast %125 : vector<32x1xf32> to vector<32x256xf32>
    %127 = arith.subf %110, %126 : vector<32x256xf32>
    %128 = math.exp %127 : vector<32x256xf32>
    %cst_31 = arith.constant dense<0.000000e+00> : vector<32xf32>
    %129 = vector.multi_reduction <add>, %128, %cst_31 [1] : vector<32x256xf32> to vector<32xf32>
    %130 = vector.shape_cast %129 : vector<32xf32> to vector<32x1xf32>
    %131 = tpu.reciprocal %130 {approx = true} : vector<32x1xf32> -> vector<32x1xf32>
    %132 = vector.broadcast %131 : vector<32x1xf32> to vector<32x256xf32>
    %133 = arith.mulf %128, %132 : vector<32x256xf32>
    %cst_32 = arith.constant dense<0.000000e+00> : vector<32x32xf32>
    %134 = tpu.matmul %111, %133, %cst_32 {dimension_numbers = #tpu.dot_dimension_numbers<[1], [1], [0], [0], [0, 0, 1, 0], [], []>} : vector<32x256xf32>, vector<32x256xf32>, vector<32x32xf32> -> vector<32x32xf32>
    %135 = arith.mulf %134, %4 : vector<32x32xf32>
    %cst_33 = arith.constant dense<0.000000e+00> : vector<4x32xf32>
    %136 = tpu.matmul %1, %135, %cst_33 {dimension_numbers = #tpu.dot_dimension_numbers<[1], [0], [0], [1], [0, 0, 1, 1], [], []>} : vector<4x32xf32>, vector<32x32xf32>, vector<4x32xf32> -> vector<4x32xf32>
    %cst_34 = arith.constant dense<0.000000e+00> : vector<4x256xf32>
    %137 = tpu.matmul %136, %123, %cst_34 {dimension_numbers = #tpu.dot_dimension_numbers<[1], [0], [0], [1], [0, 0, 1, 1], [], []>} : vector<4x32xf32>, vector<32x256xf32>, vector<4x256xf32> -> vector<4x256xf32>
    %138 = vector.broadcast %2 : vector<4x1xf32> to vector<4x256xf32>
    %139 = arith.addf %137, %138 : vector<4x256xf32>
    %cst_35 = arith.constant dense<0.000000e+00> : vector<256xf32>
    %140 = vector.multi_reduction <add>, %139, %cst_35 [0] : vector<4x256xf32> to vector<256xf32>
    %141 = vector.shape_cast %140 : vector<256xf32> to vector<1x256xf32>
    %cst_36 = arith.constant 4.000000e+00 : f32
    %142 = vector.broadcast %cst_36 : f32 to vector<1x256xf32>
    %143 = arith.divf %141, %142 : vector<1x256xf32>
    %144 = vector.broadcast %143 : vector<1x256xf32> to vector<4x256xf32>
    %145 = arith.subf %139, %144 : vector<4x256xf32>
    %146 = arith.mulf %145, %145 : vector<4x256xf32>
    %cst_37 = arith.constant dense<0.000000e+00> : vector<256xf32>
    %147 = vector.multi_reduction <add>, %146, %cst_37 [0] : vector<4x256xf32> to vector<256xf32>
    %148 = vector.shape_cast %147 : vector<256xf32> to vector<1x256xf32>
    %cst_38 = arith.constant 4.000000e+00 : f32
    %149 = vector.broadcast %cst_38 : f32 to vector<1x256xf32>
    %150 = arith.divf %148, %149 : vector<1x256xf32>
    %151 = vector.broadcast %143 : vector<1x256xf32> to vector<4x256xf32>
    %152 = arith.subf %139, %151 : vector<4x256xf32>
    %cst_39 = arith.constant 9.99999974E-6 : f32
    %153 = vector.broadcast %cst_39 : f32 to vector<1x256xf32>
    %154 = arith.addf %150, %153 : vector<1x256xf32>
    %155 = math.rsqrt %154 : vector<1x256xf32>
    %156 = vector.broadcast %155 : vector<1x256xf32> to vector<4x256xf32>
    %157 = arith.mulf %152, %156 : vector<4x256xf32>
    %158 = vector.broadcast %3 : vector<4x1xf32> to vector<4x256xf32>
    %159 = arith.mulf %157, %158 : vector<4x256xf32>
    %c1_40 = arith.constant 1 : index
    %c0_41 = arith.constant 0 : index
    %c0_42 = arith.constant 0 : index
    %160 = vector.load %arg7[%c1_40, %c0_41, %c0_42] : memref<2x4x256xf32, #tpu.memory_space<vmem>>, vector<1x4x256xf32>
    %161 = vector.shape_cast %160 : vector<1x4x256xf32> to vector<4x256xf32>
    %162 = vector.shape_cast %159 : vector<4x256xf32> to vector<1x4x256xf32>
    tpu.vector_store %arg7[%c1_40, %c0_41, %c0_42], %162 {strides = array<i32>} : memref<2x4x256xf32, #tpu.memory_space<vmem>>, vector<1x4x256xf32>,
    return
  }
  func.func @transform_0(%arg0: i32) -> (i32, i32, i32) {
    %c0_i32 = arith.constant 0 : i32
    %c0_i32_0 = arith.constant 0 : i32
    %c0_i32_1 = arith.constant 0 : i32
    return %arg0, %c0_i32, %c0_i32_0 : i32, i32, i32
  }
  func.func @transform_1(%arg0: i32) -> (i32, i32) {
    %c0_i32 = arith.constant 0 : i32
    %c0_i32_0 = arith.constant 0 : i32
    %c0_i32_1 = arith.constant 0 : i32
    return %c0_i32, %c0_i32_0 : i32, i32
  }
  func.func @transform_2(%arg0: i32) -> (i32, i32) {
    %c0_i32 = arith.constant 0 : i32
    %c0_i32_0 = arith.constant 0 : i32
    %c0_i32_1 = arith.constant 0 : i32
    return %c0_i32, %c0_i32_0 : i32, i32
  }
  func.func @transform_3(%arg0: i32) -> (i32, i32) {
    %c0_i32 = arith.constant 0 : i32
    %c0_i32_0 = arith.constant 0 : i32
    %c0_i32_1 = arith.constant 0 : i32
    return %c0_i32, %c0_i32_0 : i32, i32
  }
  func.func @transform_4(%arg0: i32) -> (i32, i32) {
    %c0_i32 = arith.constant 0 : i32
    %c0_i32_0 = arith.constant 0 : i32
    %c0_i32_1 = arith.constant 0 : i32
    return %c0_i32, %c0_i32_0 : i32, i32
  }
  func.func @transform_5(%arg0: i32) -> (i32, i32) {
    %c0_i32 = arith.constant 0 : i32
    %c0_i32_0 = arith.constant 0 : i32
    %c0_i32_1 = arith.constant 0 : i32
    return %c0_i32, %c0_i32_0 : i32, i32
  }
  func.func @transform_6(%arg0: i32) -> (i32, i32, i32) {
    %c0_i32 = arith.constant 0 : i32
    %c0_i32_0 = arith.constant 0 : i32
    %c0_i32_1 = arith.constant 0 : i32
    return %arg0, %c0_i32, %c0_i32_0 : i32, i32, i32
  }
}

</mosaic_0001>

<bundles_post_ra>
// kernel: tpu_custom_call.1
= control target key start
LH: loop header
LB: loop body
LE: loop exit
PB: predicated region body
PF: predicated region fallthrough
CT: control target
= control target key end

     0   :  { %v2586_v1 = vmov 2   ;;  %v2584_v2 = vmov 0   ;;  %s2573_s0 = inlined_call_operand.vmem [shape: f32[2,4,256], index: 0, kind: input, shape index: {}]   ;;  %s2574_s1 = inlined_call_operand.vmem [shape: f32[32,32], index: 1, kind: input, shape index: {}]   ;;  %s2575_s2 = inlined_call_operand.vmem [shape: f32[96,4], index: 2, kind: input, shape index: {}]   ;;  %s2576_s3 = inlined_call_operand.vmem [shape: f32[4,32], index: 3, kind: input, shape index: {}]   ;;  %s2577_s4 = inlined_call_operand.vmem [shape: f32[4,1], index: 4, kind: input, shape index: {}]   ;;  %s2578_s5 = inlined_call_operand.vmem [shape: f32[4,1], index: 5, kind: input, shape index: {}]   ;;  %s2579_s6 = inlined_call_operand.hbm [shape: f32[2,4,256], index: 6, kind: output, shape index: {}]  }
   0x1   :  { %v31_v0 = vld [vmem:[%s2575_s2 + $0x38] sm:$0xff]  ;;  %1471 = vset.pattern.permute.xlu1 %v2586_v1  ;;  %1470 = vset.pattern.permute.xlu0 %v2584_v2 }
   0x2   :  { %11 = vsyncpa [#allocation3], 0  ;;  %266 = vperm.xlu1 %1471, %v31_v0   ;;  %81 = vperm.xlu0 %1470, %v31_v0   ;;  %v30_v3 = vld [vmem:[%s2575_s2 + $0x30] sm:$0xff]  ;;  %v2580_v4 = vmov 1   ;;  %v28_v5 = vld [vmem:[%s2575_s2 + $0x20] sm:$0xff]  ;;  %v2582_v6 = vmov 3  }
   0x3   :  { %1473 = vset.pattern.permute.xlu2 %v2580_v4  ;;  %v29_v7 = vld [vmem:[%s2575_s2 + $0x28] sm:$0xff]  ;;  %v1734_v8 = vld [vmem:[%s2575_s2 + $0x40] sm:$0xff]  ;;  %vm699_vm0 = vcmask 261120   ;;  %vm771_vm1 = vcmask 1043456   ;;  %s1669_s13 = smov 128   ;;  %s1670_s14 = smov 8  }
   0x4   :  { %160 = vperm.xlu2 %1473, %v30_v3   ;;  %2599 = vst [vmem:[#allocation5_spill] sm:$0xff] %v1734_v8  ;;  %v1745_v9 = vld [vmem:[%s2575_s2 + $0x48] sm:$0xff]  ;;  %v43_v17 = vld [vmem:[%s2573_s0] sm:$0xff] }
   0x5   :  { %2600 = vst [vmem:[#allocation6_spill] sm:$0xff] %v1745_v9  ;;  %v1458_v12 = vld [vmem:[%s2573_s0 + $0x8] sm:$0xff]  ;;  %v183_v21 = vperm.slane %v43_v17, 1  ;;  %v184_v22 = vperm.slane %v43_v17, 5  ;;  %v387_v25 = vperm.slane %v43_v17, 3  ;;  %v388_v26 = vperm.slane %v43_v17, 7 }
   0x6   :  { %v885_v15 = vperm.slane %v1458_v12, 1  ;;  %v886_v16 = vperm.slane %v1458_v12, 5  ;;  %v855_v18 = vperm.slane %v1458_v12, 0  ;;  %v856_v19 = vperm.slane %v1458_v12, 4  ;;  %s1443_s0 = sshll.u32 %s2579_s6, 4  ;;  %s1444_s0 = int_to_ptr.hbm [resolvable:$true] %s1443_s0 }
   0x7   :  { %v993_v29 = vperm.slane %v1458_v12, 3  ;;  %v994_v30 = vperm.slane %v1458_v12, 7  ;;  %v1767_v31 = vperm.slane %v183_v21, 1  ;;  %v285_v32 = vperm.slane %v43_v17, 2 }
   0x8   :  { %v1759_v23 = vperm.slane %v885_v15, 1  ;;  %v1761_v24 = vperm.slane %v886_v16, 1  ;;  %v1763_v27 = vperm.slane %v855_v18, 0  ;;  %v1765_v28 = vperm.slane %v856_v19, 0 }
   0x9   :  { %v286_v33 = vperm.slane %v43_v17, 6  ;;  %v939_v34 = vperm.slane %v1458_v12, 2  ;;  %v1769_v35 = vperm.slane %v184_v22, 1  ;;  %v940_v36 = vperm.slane %v1458_v12, 6 }
   0xa   :  { %1472 = vset.pattern.permute.xlu1 %v2584_v2  ;;  %66 = vperm.xlu0 %1470, %v28_v5   ;;  %v105_v37 = vperm.slane %v43_v17, 0  ;;  %v106_v38 = vperm.slane %v43_v17, 4  ;;  %v1775_v43 = vperm.slane %v387_v25, 3  ;;  %v1777_v44 = vperm.slane %v388_v26, 3 }
   0xb   :  { %76 = vperm.xlu1 %1472, %v30_v3   ;;  %v1781_v47 = vperm.slane %v993_v29, 3  ;;  %v1783_v48 = vperm.slane %v994_v30, 3  ;;  %v1785_v49 = vperm.slane %v285_v32, 2  ;;  %v1787_v50 = vperm.slane %v286_v33, 2 }
   0xc   :  { %1474 = vset.pattern.permute.xlu2 %v2582_v6  ;;  %2601 = vst [vmem:[#allocation7_spill] sm:$0xff] %v1775_v43  ;;  %v1789_v51 = vperm.slane %v939_v34, 2  ;;  %v1791_v52 = vperm.slane %v940_v36, 2  ;;  %v1793_v53 = vperm.slane %v105_v37, 0  ;;  %v1797_v59 = vperm.slane %v106_v38, 0 }
   0xd   :  { %368 = vperm.xlu2 %1474, %v31_v0   ;;  %2602 = vst [vmem:[#allocation8_spill] sm:$0xff] %v1777_v44 }
  0x12   :  { %1479 = vset.pattern.permute.xlu0 %v2580_v4 }
  0x13   :  { %1475 = vset.pattern.permute.xlu1 %v2586_v1  ;;  %164 = vperm.xlu0 %1479, %v31_v0  }
  0x14   :  { %262 = vperm.xlu1 %1475, %v30_v3  }
  0x15   :  { %1476 = vset.pattern.permute.xlu2 %v2584_v2 }
  0x16   :  { %71 = vperm.xlu2 %1476, %v29_v7  }
  0x1b   :  { %156 = vperm.xlu0 %1479, %v29_v7  }
  0x1c   :  { %1477 = vset.pattern.permute.xlu1 %v2582_v6 }
  0x1d   :  { %364 = vperm.xlu1 %1477, %v30_v3  }
  0x1e   :  { %1478 = vset.pattern.permute.xlu2 %v2586_v1 }
  0x1f   :  { %258 = vperm.xlu2 %1478, %v29_v7  }
  0x25   :  { %1480 = vset.pattern.permute.xlu1 %v2580_v4 }
  0x26   :  { %152 = vperm.xlu1 %1480, %v28_v5  }
  0x27   :  { %1481 = vset.pattern.permute.xlu2 %v2582_v6 }
  0x28   :  { %360 = vperm.xlu2 %1481, %v29_v7  }
  0x2e   :  { %1482 = vset.pattern.permute.xlu1 %v2586_v1 }
  0x2f   :  { %254 = vperm.xlu1 %1482, %v28_v5  }
  0x30   :  { %356 = vperm.xlu2 %1481, %v28_v5  }
  0x37   :  { %1483 = vset.pattern.permute.xlu1 %v2584_v2 }
  0x38   :  { %86 = vperm.xlu1 %1483, %v1734_v8   ;;  %1484 = vset.pattern.permute.xlu2 %v2580_v4 }
  0x39   :  { %168 = vperm.xlu2 %1484, %v1734_v8  }
  0x40   :  { %1485 = vset.pattern.permute.xlu1 %v2582_v6 }
  0x41   :  { %372 = vperm.xlu1 %1485, %v1734_v8   ;;  %1486 = vset.pattern.permute.xlu2 %v2584_v2 }
  0x42   :  { %91 = vperm.xlu2 %1486, %v1745_v9  }
  0x49   :  { %1487 = vset.pattern.permute.xlu1 %v2580_v4 }
  0x4a   :  { %172 = vperm.xlu1 %1487, %v1745_v9   ;;  %1488 = vset.pattern.permute.xlu2 %v2586_v1 }
  0x52   :  { %1489 = vset.pattern.permute.xlu1 %v2582_v6 }
  0x5e   :  { %v161_v10 = vpop.permute.xlu2 %160 }
  0x5f   :  { %v903_v40 = vmul.f32 %v1759_v23, %v161_v10  ;;  %v904_v41 = vmul.f32 %v1761_v24, %v161_v10  ;;  %v201_v57 = vmul.f32 %v1767_v31, %v161_v10  ;;  %v202_v58 = vmul.f32 %v1769_v35, %v161_v10 }
  0x67   :  { %v369_v11 = vpop.permute.xlu2 %368 }
  0x68   :  { %v407_v60 = vmul.f32 %v1775_v43, %v369_v11  ;;  %v408_v62 = vmul.f32 %v1777_v44, %v369_v11  ;;  %v1013_v63 = vmul.f32 %v1781_v47, %v369_v11  ;;  %v1014_v0 = vmul.f32 %v1783_v48, %v369_v11 }
  0x70   :  { %v72_v20 = vpop.permute.xlu2 %71 }
  0x71   :  { %v1801_v61 = vmul.f32 %v1793_v53, %v72_v20  ;;  %v122_v5 = vmul.f32 %v1797_v59, %v72_v20  ;;  %v871_v7 = vmul.f32 %v1763_v27, %v72_v20  ;;  %v872_v10 = vmul.f32 %v1765_v28, %v72_v20 }
  0x74   :  { %v267_v13 = vpop.permute.xlu1 %266  ;;  %v82_v14 = vpop.permute.xlu0 %81 }
  0x75   :  { %v305_v3 = vmul.f32 %v1785_v49, %v267_v13  ;;  %v306_v12 = vmul.f32 %v1787_v50, %v267_v13  ;;  %v959_v15 = vmul.f32 %v1789_v51, %v267_v13  ;;  %v960_v16 = vmul.f32 %v1791_v52, %v267_v13 }
  0x76   :  { %v125_v17 = vmul.f32 %v1793_v53, %v82_v14  ;;  %v126_v18 = vmul.f32 %v1797_v59, %v82_v14  ;;  %v875_v11 = vmul.f32 %v1763_v27, %v82_v14  ;;  %v876_v19 = vmul.f32 %v1765_v28, %v82_v14 }
  0x79   :  { %v259_v54 = vpop.permute.xlu2 %258 }
  0x7a   :  { %v301_v22 = vmul.f32 %v1785_v49, %v259_v54  ;;  %v302_v14 = vmul.f32 %v1787_v50, %v259_v54 }
  0x7c   :  { %v1771_v39 = vpop.permute.xlu0 %66 }
  0x7d   :  { %v77_v42 = vpop.permute.xlu1 %76 }
  0x7e   :  { %v873_v45 = vmul.f32 %v1763_v27, %v77_v42  ;;  %v874_v46 = vmul.f32 %v1765_v28, %v77_v42  ;;  %v123_v30 = vmul.f32 %v1793_v53, %v77_v42 }
  0x80   :  { %v927_v55 = vadd.f32 %v903_v40, %v873_v45  ;;  %v928_v56 = vadd.f32 %v904_v41, %v874_v46  ;;  %v124_v40 = vmul.f32 %v1797_v59, %v77_v42  ;;  %v955_v41 = vmul.f32 %v1789_v51, %v259_v54 }
  0x82   :  { %v361_v6 = vpop.permute.xlu2 %360 }
  0x85   :  { %v165_v21 = vpop.permute.xlu0 %164 }
  0x86   :  { %v203_v25 = vmul.f32 %v1767_v31, %v165_v21  ;;  %v204_v20 = vmul.f32 %v1769_v35, %v165_v21  ;;  %v905_v26 = vmul.f32 %v1759_v23, %v165_v21  ;;  %v906_v29 = vmul.f32 %v1761_v24, %v165_v21  ;;  %v263_v13 = vpop.permute.xlu1 %262 }
  0x87   :  { %v957_v32 = vmul.f32 %v1789_v51, %v263_v13  ;;  %v958_v33 = vmul.f32 %v1791_v52, %v263_v13  ;;  %v303_v9 = vmul.f32 %v1785_v49, %v263_v13  ;;  %v304_v8 = vmul.f32 %v1787_v50, %v263_v13 }
  0x88   :  { %v227_v34 = vadd.f32 %v203_v25, %v125_v17  ;;  %v228_v36 = vadd.f32 %v204_v20, %v126_v18  ;;  %v929_v37 = vadd.f32 %v905_v26, %v875_v11  ;;  %v930_v38 = vadd.f32 %v906_v29, %v876_v19 }
  0x89   :  { %v981_v45 = vadd.f32 %v957_v32, %v927_v55  ;;  %v982_v46 = vadd.f32 %v958_v33, %v928_v56  ;;  %v956_v17 = vmul.f32 %v1791_v52, %v259_v54  ;;  %v225_v18 = vadd.f32 %v201_v57, %v123_v30 }
  0x8a   :  { %v329_v21 = vadd.f32 %v305_v3, %v227_v34  ;;  %v330_v4 = vadd.f32 %v306_v12, %v228_v36  ;;  %v983_v2 = vadd.f32 %v959_v15, %v929_v37  ;;  %v984_v1 = vadd.f32 %v960_v16, %v930_v38 }
  0x8b   :  { %v226_v3 = vadd.f32 %v202_v58, %v124_v40  ;;  %v403_v12 = vmul.f32 %v1775_v43, %v361_v6  ;;  %v404_v15 = vmul.f32 %v1777_v44, %v361_v6  ;;  %v1009_v16 = vmul.f32 %v1781_v47, %v361_v6 }
  0x8c   :  { %v1831_v11 = vadd.f32 %v407_v60, %v329_v21  ;;  %v1833_v19 = vadd.f32 %v408_v62, %v330_v4  ;;  %v1835_v42 = vadd.f32 %v1013_v63, %v983_v2  ;;  %v1837_v55 = vadd.f32 %v1014_v0, %v984_v1 }
  0x8d   :  { %v157_v56 = vpop.permute.xlu0 %156  ;;  %v327_v60 = vadd.f32 %v303_v9, %v225_v18  ;;  %v328_v58 = vadd.f32 %v304_v8, %v226_v3  ;;  %v1010_v62 = vmul.f32 %v1783_v48, %v361_v6 }
  0x8e   :  { %v199_v25 = vmul.f32 %v1767_v31, %v157_v56  ;;  %v200_v54 = vmul.f32 %v1769_v35, %v157_v56  ;;  %v901_v57 = vmul.f32 %v1759_v23, %v157_v56  ;;  %v902_v4 = vmul.f32 %v1761_v24, %v157_v56 }
  0x8f   :  { %v365_v2 = vpop.permute.xlu1 %364  ;;  %v586_v1 = vmax.f32 %v1831_v11, %v1833_v19 }
  0x90   :  { %v405_v63 = vmul.f32 %v1775_v43, %v365_v2  ;;  %v406_v0 = vmul.f32 %v1777_v44, %v365_v2  ;;  %v223_v20 = vadd.f32 %v199_v25, %v1801_v61  ;;  %v224_v26 = vadd.f32 %v200_v54, %v122_v5 }
  0x91   :  { %587 = vmax.xlane.f32.xlu0 %v586_v1  ;;  %v1011_v29 = vmul.f32 %v1781_v47, %v365_v2  ;;  %v1012_v13 = vmul.f32 %v1783_v48, %v365_v2  ;;  %v925_v30 = vadd.f32 %v901_v57, %v871_v7  ;;  %v926_v32 = vadd.f32 %v902_v4, %v872_v10 }
  0x92   :  { %v1854_v33 = vadd.f32 %v405_v63, %v327_v60  ;;  %v1856_v9 = vadd.f32 %v406_v0, %v328_v58  ;;  %v325_v8 = vadd.f32 %v301_v22, %v223_v20  ;;  %v326_v6 = vadd.f32 %v302_v14, %v224_v26  ;;  %v34_v58 = vld [vmem:[%s2575_s2 + $0x50] sm:$0xff] }
  0x93   :  { %v1858_v34 = vadd.f32 %v1011_v29, %v981_v45  ;;  %v1860_v36 = vadd.f32 %v1012_v13, %v982_v46  ;;  %v979_v37 = vadd.f32 %v955_v41, %v925_v30  ;;  %v980_v61 = vadd.f32 %v956_v17, %v926_v32 }
  0x94   :  { %v583_v5 = vmax.f32 %v1854_v33, %v1856_v9  ;;  %v1864_v38 = vadd.f32 %v403_v12, %v325_v8  ;;  %v1866_v40 = vadd.f32 %v404_v15, %v326_v6  ;;  %v869_v41 = vmul.f32 %v1763_v27, %v1771_v39  ;;  %v357_v12 = vpop.permute.xlu2 %356 }
  0x95   :  { %v1868_v7 = vadd.f32 %v1009_v16, %v979_v37  ;;  %v1870_v10 = vadd.f32 %v1010_v62, %v980_v61  ;;  %v870_v45 = vmul.f32 %v1765_v28, %v1771_v39  ;;  %v119_v15 = vmul.f32 %v1793_v53, %v1771_v39 }
  0x96   :  { %584 = vmax.xlane.f32.xlu1 %v583_v5  ;;  %v580_v22 = vmax.f32 %v1864_v38, %v1866_v40  ;;  %v120_v16 = vmul.f32 %v1797_v59, %v1771_v39  ;;  %v401_v62 = vmul.f32 %v1775_v43, %v357_v12  ;;  %v402_v63 = vmul.f32 %v1777_v44, %v357_v12 }
  0x97   :  { %v1007_v39 = vmul.f32 %v1781_v47, %v357_v12  ;;  %v1008_v0 = vmul.f32 %v1783_v48, %v357_v12 }
  0x98   :  { %v153_v14 = vpop.permute.xlu1 %152  ;;  %581 = vmax.xlane.f32.xlu2 %v580_v22 }
  0x99   :  { %v899_v46 = vmul.f32 %v1759_v23, %v153_v14  ;;  %v900_v21 = vmul.f32 %v1761_v24, %v153_v14  ;;  %v197_v56 = vmul.f32 %v1767_v31, %v153_v14  ;;  %v198_v3 = vmul.f32 %v1769_v35, %v153_v14 }
  0x9b   :  { %v923_v17 = vadd.f32 %v899_v46, %v869_v41  ;;  %v924_v18 = vadd.f32 %v900_v21, %v870_v45  ;;  %v221_v54 = vadd.f32 %v197_v56, %v119_v15  ;;  %v222_v57 = vadd.f32 %v198_v3, %v120_v16  ;;  %v2604_v15 = vld [vmem:[#allocation5_spill] sm:$0xff]  ;;  %v2605_v16 = vld [vmem:[#allocation6_spill] sm:$0xff] }
  0x9c   :  { %v169_v8 = vpop.permute.xlu2 %168  ;;  %v2603_v56 = vmov 2  }
  0x9d   :  { %v907_v5 = vmul.f32 %v1759_v23, %v169_v8  ;;  %v908_v22 = vmul.f32 %v1761_v24, %v169_v8  ;;  %v205_v41 = vmul.f32 %v1767_v31, %v169_v8  ;;  %v206_v45 = vmul.f32 %v1769_v35, %v169_v8 }
  0xa1   :  { %v255_v25 = vpop.permute.xlu1 %254 }
  0xa2   :  { %v299_v4 = vmul.f32 %v1785_v49, %v255_v25  ;;  %v300_v2 = vmul.f32 %v1787_v50, %v255_v25  ;;  %v953_v1 = vmul.f32 %v1789_v51, %v255_v25  ;;  %v954_v60 = vmul.f32 %v1791_v52, %v255_v25 }
  0xa4   :  { %v323_v20 = vadd.f32 %v299_v4, %v221_v54  ;;  %v324_v26 = vadd.f32 %v300_v2, %v222_v57  ;;  %v977_v29 = vadd.f32 %v953_v1, %v923_v17  ;;  %v978_v13 = vadd.f32 %v954_v60, %v924_v18  ;;  %v1930_v57 = vld [vmem:[%s2575_s2 + $0x58] sm:$0xff] }
  0xa5   :  { %176 = vperm.xlu0 %1479, %v34_v58   ;;  %v2606_v4 = vmov 0   ;;  %v2607_v2 = vmov 3   ;;  %v2608_v1 = vmov 1  }
  0xa6   :  { %v1897_v30 = vadd.f32 %v401_v62, %v323_v20  ;;  %v1899_v32 = vadd.f32 %v402_v63, %v324_v26  ;;  %v1901_v6 = vadd.f32 %v1007_v39, %v977_v29  ;;  %v1903_v37 = vadd.f32 %v1008_v0, %v978_v13  ;;  %v1941_v63 = vpop.permute.xlu2 %91 }
  0xa8   :  { %v577_v61 = vmax.f32 %v1897_v30, %v1899_v32 }
  0xaa   :  { %578 = vmax.xlane.f32.xlu2 %v577_v61  ;;  %v87_v14 = vpop.permute.xlu1 %86 }
  0xab   :  { %v127_v46 = vmul.f32 %v1793_v53, %v87_v14  ;;  %v128_v21 = vmul.f32 %v1797_v59, %v87_v14  ;;  %v877_v17 = vmul.f32 %v1763_v27, %v87_v14  ;;  %v878_v18 = vmul.f32 %v1765_v28, %v87_v14 }
  0xad   :  { %1491 = vset.pattern.permute.xlu0 %v2603_v56  ;;  %v1916_v3 = vadd.f32 %v907_v5, %v877_v17  ;;  %v1918_v12 = vadd.f32 %v908_v22, %v878_v18  ;;  %v1922_v25 = vadd.f32 %v205_v41, %v127_v46  ;;  %v1924_v54 = vadd.f32 %v206_v45, %v128_v21 }
  0xae   :  { %270 = vperm.xlu0 %1491, %v2604_v15  }
  0xaf   :  { %376 = vperm.xlu1 %1489, %v2605_v16  }
  0xb3   :  { %v373_v60 = vpop.permute.xlu1 %372 }
  0xb7   :  { %1492 = vset.pattern.permute.xlu1 %v2603_v56 }
  0xb8   :  { %278 = vperm.xlu1 %1492, %v34_v58  }
  0xbc   :  { %v1939_v62 = vpop.permute.xlu1 %172 }
  0xc0   :  { %1494 = vset.pattern.permute.xlu1 %v2606_v4 }
  0xc1   :  { %101 = vperm.xlu1 %1494, %v1930_v57  }
  0xc2   :  { %274 = vperm.xlu2 %1488, %v2605_v16  }
  0xc9   :  { %1496 = vset.pattern.permute.xlu1 %v2607_v2 }
  0xca   :  { %1490 = vset.pattern.permute.xlu2 %v2606_v4 }
  0xcb   :  { %96 = vperm.xlu2 %1490, %v34_v58  }
  0xd3   :  { %1493 = vset.pattern.permute.xlu2 %v2607_v2 }
  0xd4   :  { %380 = vperm.xlu2 %1493, %v34_v58  }
  0xdc   :  { %1495 = vset.pattern.permute.xlu2 %v2608_v1 }
 0x104   :  { %v588_v39 = vpop.xlane.xlu0 %587 }
 0x105   :  { %v595_v0 = vsub.f32 %v1831_v11, %v588_v39  ;;  %v596_v20 = vsub.f32 %v1833_v19, %v588_v39 }
 0x107   :  { %v609_v26 = vmul.f32 1.442695, %v595_v0  ;;  %v611_v29 = vmul.f32 1.442695, %v596_v20  ;;  %v879_v20 = vmul.f32 %v1763_v27, %v1941_v63 }
 0x109   :  { %1515 = vpow2.f32 %v609_v26  ;;  %v585_v13 = vpop.xlane.xlu1 %584  ;;  %v880_v26 = vmul.f32 %v1765_v28, %v1941_v63 }
 0x10a   :  { %1517 = vpow2.f32 %v611_v29  ;;  %v593_v8 = vsub.f32 %v1854_v33, %v585_v13  ;;  %v594_v58 = vsub.f32 %v1856_v9, %v585_v13  ;;  %v1016_v29 = vmul.f32 %v1783_v48, %v373_v60 }
 0x10b   :  { %v582_v61 = vpop.xlane.xlu2 %581  ;;  %v909_v13 = vmul.f32 %v1759_v23, %v1939_v62 }
 0x10c   :  { %v605_v5 = vmul.f32 1.442695, %v593_v8  ;;  %v607_v22 = vmul.f32 1.442695, %v594_v58  ;;  %v591_v14 = vsub.f32 %v1864_v38, %v582_v61  ;;  %v592_v41 = vsub.f32 %v1866_v40, %v582_v61 }
 0x10e   :  { %1519 = vpow2.f32 %v605_v5  ;;  %v601_v11 = vmul.f32 1.442695, %v591_v14  ;;  %v603_v45 = vmul.f32 1.442695, %v592_v41  ;;  %v910_v41 = vmul.f32 %v1761_v24, %v1939_v62 }
 0x10f   :  { %v1949_v19 = vpop.eup %1515  ;;  %1521 = vpow2.f32 %v607_v22 }
 0x110   :  { %v1951_v46 = vpop.eup %1517  ;;  %1523 = vpow2.f32 %v601_v11  ;;  %v409_v11 = vmul.f32 %v1775_v43, %v373_v60 }
 0x111   :  { %1525 = vpow2.f32 %v603_v45  ;;  %v622_v33 = vadd.f32 %v1951_v46, %v1949_v19  ;;  %v410_v45 = vmul.f32 %v1777_v44, %v373_v60 }
 0x113   :  { %623 = vadd.xlane.f32.xlu0 %v622_v33 }
 0x114   :  { %v1955_v9 = vpop.eup %1519 }
 0x115   :  { %v1957_v21 = vpop.eup %1521 }
 0x116   :  { %v1959_v38 = vpop.eup %1523  ;;  %v619_v40 = vadd.f32 %v1957_v21, %v1955_v9 }
 0x117   :  { %v1963_v17 = vpop.eup %1525  ;;  %v1965_v18 = vpop.permute.xlu0 %176 }
 0x118   :  { %620 = vadd.xlane.f32.xlu1 %v619_v40  ;;  %v616_v15 = vadd.f32 %v1963_v17, %v1959_v38 }
 0x11a   :  { %617 = vadd.xlane.f32.xlu2 %v616_v15 }
 0x11d   :  { %v579_v16 = vpop.xlane.xlu2 %578 }
 0x11e   :  { %v589_v39 = vsub.f32 %v1897_v30, %v579_v16  ;;  %v590_v0 = vsub.f32 %v1899_v32, %v579_v16  ;;  %v1015_v16 = vmul.f32 %v1781_v47, %v373_v60 }
 0x120   :  { %v597_v8 = vmul.f32 1.442695, %v589_v39  ;;  %v599_v58 = vmul.f32 1.442695, %v590_v0  ;;  %v271_v61 = vpop.permute.xlu0 %270 }
 0x121   :  { %v961_v5 = vmul.f32 %v1789_v51, %v271_v61  ;;  %v962_v30 = vmul.f32 %v1791_v52, %v271_v61  ;;  %v1980_v22 = vpop.permute.xlu1 %376  ;;  %v307_v32 = vmul.f32 %v1785_v49, %v271_v61  ;;  %v308_v14 = vmul.f32 %v1787_v50, %v271_v61 }
 0x122   :  { %1527 = vpow2.f32 %v597_v8  ;;  %v1018_v60 = vmul.f32 %v1783_v48, %v1980_v22 }
 0x123   :  { %1529 = vpow2.f32 %v599_v58  ;;  %v986_v33 = vadd.f32 %v962_v30, %v1918_v12  ;;  %v331_v40 = vadd.f32 %v307_v32, %v1922_v25  ;;  %v332_v15 = vadd.f32 %v308_v14, %v1924_v54 }
 0x124   :  { %v985_v39 = vadd.f32 %v961_v5, %v1916_v3  ;;  %v933_v58 = vadd.f32 %v909_v13, %v879_v20  ;;  %v1017_v25 = vmul.f32 %v1781_v47, %v1980_v22  ;;  %v934_v54 = vadd.f32 %v910_v41, %v880_v26 }
 0x125   :  { %v1993_v0 = vpop.permute.xlu2 %274  ;;  %v1995_v61 = vadd.f32 %v409_v11, %v331_v40  ;;  %v1997_v8 = vadd.f32 %v410_v45, %v332_v15  ;;  %v1999_v43 = vadd.f32 %v1016_v29, %v986_v33  ;;  %v911_v41 = vmul.f32 %v1759_v23, %v1965_v18 }
 0x126   :  { %v2001_v44 = vadd.f32 %v1015_v16, %v985_v39  ;;  %v963_v12 = vmul.f32 %v1789_v51, %v1993_v0  ;;  %v964_v3 = vmul.f32 %v1791_v52, %v1993_v0  ;;  %v912_v11 = vmul.f32 %v1761_v24, %v1965_v18 }
 0x127   :  { %2609 = vst [vmem:[#allocation5_spill] sm:$0xff] %v1999_v43 }
 0x128   :  { %2610 = vst [vmem:[#allocation6_spill] sm:$0xff] %v2001_v44  ;;  %v2011_v5 = vpop.eup %1527  ;;  %v987_v29 = vadd.f32 %v963_v12, %v933_v58  ;;  %v988_v32 = vadd.f32 %v964_v3, %v934_v54  ;;  %v1189_v54 = vmax.f32 %v1858_v34, %v1860_v36  ;;  %v1192_v3 = vmax.f32 %v1835_v42, %v1837_v55 }
 0x129   :  { %v2013_v30 = vpop.eup %1529 }
 0x12a   :  { %v613_v20 = vadd.f32 %v2013_v30, %v2011_v5  ;;  %v2017_v13 = vadd.f32 %v1017_v25, %v987_v29  ;;  %v2019_v14 = vpop.permute.xlu1 %278  ;;  %v2021_v26 = vadd.f32 %v1018_v60, %v988_v32  ;;  %v1186_v60 = vmax.f32 %v1868_v7, %v1870_v10  ;;  %v26_v32 = vld [vmem:[%s2575_s2 + $0x10] sm:$0xff] }
 0x12b   :  { %v965_v15 = vmul.f32 %v1789_v51, %v2019_v14  ;;  %v966_v16 = vmul.f32 %v1791_v52, %v2019_v14  ;;  %v1183_v29 = vmax.f32 %v1901_v6, %v1903_v37 }
 0x12c   :  { %2611 = vst [vmem:[#allocation9_spill] sm:$0xff] %v2017_v13  ;;  %614 = vadd.xlane.f32.xlu0 %v613_v20 }
 0x12d   :  { %2612 = vst [vmem:[#allocation10_spill] sm:$0xff] %v2021_v26  ;;  %v2027_v45 = vpop.permute.xlu2 %96 }
 0x12e   :  { %v881_v33 = vmul.f32 %v1763_v27, %v2027_v45  ;;  %v882_v40 = vmul.f32 %v1765_v28, %v2027_v45 }
 0x130   :  { %v935_v39 = vadd.f32 %v911_v41, %v881_v33  ;;  %v936_v58 = vadd.f32 %v912_v11, %v882_v40  ;;  %v2068_v41 = vld [vmem:[%s2575_s2 + $0x8] sm:$0xff] }
 0x131   :  { %384 = vperm.xlu1 %1496, %v1930_v57  }
 0x132   :  { %v2038_v12 = vadd.f32 %v965_v15, %v935_v39  ;;  %v2040_v25 = vadd.f32 %v966_v16, %v936_v58  ;;  %180 = vperm.xlu2 %1495, %v1930_v57  }
 0x133   :  { %v2063_v20 = vpop.permute.xlu1 %101 }
 0x134   :  { %2613 = vst [vmem:[#allocation11_spill] sm:$0xff] %v2038_v12 }
 0x135   :  { %2614 = vst [vmem:[#allocation12_spill] sm:$0xff] %v2040_v25  ;;  %v2072_v11 = vpop.permute.xlu2 %380 }
 0x136   :  { %2615 = vst [vmem:[#allocation13_spill] sm:$0xff] %v2072_v11 }
 0x139   :  { %1498 = vset.pattern.permute.xlu1 %v2608_v1 }
 0x13a   :  { %1497 = vset.pattern.permute.xlu2 %v2606_v4 }
 0x140   :  { %282 = vperm.xlu0 %1491, %v1930_v57   ;;  %v27_v57 = vld [vmem:[%s2575_s2 + $0x18] sm:$0xff] }
 0x148   :  { %1499 = vset.pattern.permute.xlu0 %v2606_v4 }
 0x15b   :  { %1190 = vmax.xlane.f32.xlu1 %v1189_v54  ;;  %1193 = vmax.xlane.f32.xlu2 %v1192_v3 }
 0x16a   :  { %1187 = vmax.xlane.f32.xlu0 %v1186_v60 }
 0x172   :  { %1184 = vmax.xlane.f32.xlu0 %v1183_v29  ;;  %v883_v29 = vmul.f32 %v1763_v27, %v2063_v20 }
 0x173   :  { %61 = vperm.xlu2 %1497, %v27_v57  }
 0x174   :  { %148 = vperm.xlu1 %1498, %v27_v57  }
 0x17b   :  { %1500 = vset.pattern.permute.xlu2 %v2608_v1 }
 0x17c   :  { %1501 = vset.pattern.permute.xlu1 %v2603_v56  ;;  %144 = vperm.xlu2 %1500, %v26_v32  }
 0x17d   :  { %250 = vperm.xlu1 %1501, %v27_v57  }
 0x184   :  { %1502 = vset.pattern.permute.xlu2 %v2606_v4 }
 0x185   :  { %1503 = vset.pattern.permute.xlu1 %v2608_v1  ;;  %51 = vperm.xlu2 %1502, %v2068_v41  }
 0x186   :  { %v624_v33 = vpop.xlane.xlu0 %623  ;;  %140 = vperm.xlu1 %1503, %v2068_v41   ;;  %56 = vperm.xlu0 %1499, %v26_v32  }
 0x187   :  { %1531 = vrcp.f32 %v624_v33 }
 0x18b   :  { %v621_v40 = vpop.xlane.xlu1 %620 }
 0x18c   :  { %1533 = vrcp.f32 %v621_v40  ;;  %v884_v40 = vmul.f32 %v1765_v28, %v2063_v20 }
 0x18d   :  { %v1532_v15 = vpop.eup %1531  ;;  %v618_v16 = vpop.xlane.xlu2 %617  ;;  %1504 = vset.pattern.permute.xlu2 %v2603_v56 }
 0x18e   :  { %v635_v39 = vmul.f32 %v1532_v15, %v1949_v19  ;;  %v636_v58 = vmul.f32 %v1532_v15, %v1951_v46  ;;  %1505 = vset.pattern.permute.xlu1 %v2607_v2  ;;  %1535 = vrcp.f32 %v618_v16  ;;  %246 = vperm.xlu2 %1504, %v26_v32   ;;  %v24_v46 = vld [vmem:[%s2575_s2] sm:$0xff] }
 0x18f   :  { %352 = vperm.xlu1 %1505, %v27_v57   ;;  %1509 = vset.pattern.permute.xlu0 %v2607_v2 }
 0x190   :  { %649 = vmatpush.xpose.msra.mxu0 %v635_v39  ;;  %678 = vmatpush.xpose.msra.mxu1 %v636_v58  ;;  %v207_v58 = vmul.f32 %v1767_v31, %v1939_v62 }
 0x191   :  { %348 = vperm.xlu0 %1509, %v26_v32  }
 0x192   :  { %v1534_v54 = vpop.eup %1533 }
 0x193   :  { %v633_v3 = vmul.f32 %v1534_v54, %v1955_v9  ;;  %v634_v60 = vmul.f32 %v1534_v54, %v1957_v21  ;;  %v208_v54 = vmul.f32 %v1769_v35, %v1939_v62 }
 0x194   :  { %v1536_v19 = vpop.eup %1535 }
 0x195   :  { %650 = vmatpush.xpose.msra.mxu0 %v633_v3  ;;  %679 = vmatpush.xpose.msra.mxu1 %v634_v60  ;;  %v2088_v57 = vpop.permute.xlu2 %180  ;;  %v631_v21 = vmul.f32 %v1536_v19, %v1959_v38  ;;  %v632_v32 = vmul.f32 %v1536_v19, %v1963_v17  ;;  %v130_v17 = vmul.f32 %v1797_v59, %v1941_v63 }
 0x196   :  { %v913_v33 = vmul.f32 %v1759_v23, %v2088_v57  ;;  %v914_v9 = vmul.f32 %v1761_v24, %v2088_v57  ;;  %1506 = vset.pattern.permute.xlu2 %v2606_v4  ;;  %v310_v19 = vmul.f32 %v1787_v50, %v1993_v0 }
 0x197   :  { %46 = vperm.xlu2 %1506, %v24_v46   ;;  %1507 = vset.pattern.permute.xlu1 %v2608_v1  ;;  %v129_v1 = vmul.f32 %v1793_v53, %v1941_v63 }
 0x198   :  { %v937_v15 = vadd.f32 %v913_v33, %v883_v29  ;;  %136 = vperm.xlu1 %1507, %v24_v46   ;;  %v938_v16 = vadd.f32 %v914_v9, %v884_v40  ;;  %v232_v29 = vadd.f32 %v208_v54, %v130_v17  ;;  %v2617_v9 = vld [vmem:[#allocation8_spill] sm:$0xff] }
 0x199   :  { %651 = vmatpush.xpose.msra.mxu0 %v631_v21  ;;  %680 = vmatpush.xpose.msra.mxu1 %v632_v32  ;;  %v231_v63 = vadd.f32 %v207_v58, %v129_v1  ;;  %v132_v21 = vmul.f32 %v1797_v59, %v2027_v45  ;;  %v312_v1 = vmul.f32 %v1787_v50, %v2019_v14 }
 0x19a   :  { %1513 = vset.pattern.permute.xlu0 %v2606_v4  ;;  %v334_v33 = vadd.f32 %v310_v19, %v232_v29 }
 0x19f   :  { %v615_v39 = vpop.xlane.xlu0 %614  ;;  %1508 = vset.pattern.permute.xlu2 %v2603_v56 }
 0x1a0   :  { %1537 = vrcp.f32 %v615_v39  ;;  %242 = vperm.xlu2 %1508, %v2068_v41   ;;  %1510 = vset.pattern.permute.xlu1 %v2603_v56  ;;  %v309_v56 = vmul.f32 %v1785_v49, %v1993_v0  ;;  %v412_v0 = vmul.f32 %v2617_v9, %v1980_v22 }
 0x1a1   :  { %238 = vperm.xlu1 %1510, %v24_v46  }
 0x1a2   :  { %v333_v62 = vadd.f32 %v309_v56, %v231_v63  ;;  %v436_v40 = vadd.f32 %v412_v0, %v334_v33 }
 0x1a6   :  { %v1538_v38 = vpop.eup %1537 }
 0x1a7   :  { %v629_v3 = vmul.f32 %v1538_v38, %v2011_v5  ;;  %v630_v60 = vmul.f32 %v1538_v38, %v2013_v30  ;;  %v2616_v5 = vld [vmem:[#allocation7_spill] sm:$0xff] }
 0x1a8   :  { %1511 = vset.pattern.permute.xlu2 %v2607_v2  ;;  %v411_v30 = vmul.f32 %v2616_v5, %v1980_v22  ;;  %v311_v22 = vmul.f32 %v1785_v49, %v2019_v14  ;;  %v413_v54 = vmul.f32 %v2616_v5, %v2072_v11 }
 0x1a9   :  { %652 = vmatpush.xpose.msra.mxu0 %v629_v3  ;;  %681 = vmatpush.xpose.msra.mxu1 %v630_v60  ;;  %v414_v3 = vmul.f32 %v2617_v9, %v2072_v11 }
 0x1aa   :  { %344 = vperm.xlu2 %1511, %v2068_v41   ;;  %1512 = vset.pattern.permute.xlu1 %v2607_v2  ;;  %v131_v41 = vmul.f32 %v1793_v53, %v2027_v45  ;;  %v209_v2 = vmul.f32 %v1767_v31, %v1965_v18  ;;  %v435_v32 = vadd.f32 %v411_v30, %v333_v62 }
 0x1ab   :  { %340 = vperm.xlu1 %1512, %v24_v46   ;;  %v211_v62 = vmul.f32 %v1767_v31, %v2088_v57  ;;  %v212_v30 = vmul.f32 %v1769_v35, %v2088_v57 }
 0x1ac   :  { %653 = vmatmul.f32.vlgmr.msra.gmra.mxu0 %v1995_v61  ;;  %682 = vmatmul.f32.vlgmr.msra.gmra.mxu1 %v1997_v8  ;;  %v210_v61 = vmul.f32 %v1769_v35, %v1965_v18  ;;  %v385_v8 = vpop.permute.xlu1 %384  ;;  %v233_v38 = vadd.f32 %v209_v2, %v131_v41 }
 0x1ad   :  { %v1021_v17 = vmul.f32 %v1781_v47, %v385_v8  ;;  %v1022_v18 = vmul.f32 %v1783_v48, %v385_v8 }
 0x1ae   :  { %v234_v46 = vadd.f32 %v210_v61, %v132_v21  ;;  %v335_v14 = vadd.f32 %v311_v22, %v233_v38 }
 0x1b0   :  { %v336_v19 = vadd.f32 %v312_v1, %v234_v46  ;;  %v437_v33 = vadd.f32 %v413_v54, %v335_v14 }
 0x1b2   :  { %v283_v39 = vpop.permute.xlu0 %282  ;;  %v438_v0 = vadd.f32 %v414_v3, %v336_v19 }
 0x1b3   :  { %v967_v45 = vmul.f32 %v1789_v51, %v283_v39  ;;  %v968_v58 = vmul.f32 %v1791_v52, %v283_v39  ;;  %1514 = vset.pattern.permute.xlu1 %v2606_v4  ;;  %v134_v4 = vmul.f32 %v1797_v59, %v2063_v20  ;;  %v314_v41 = vmul.f32 %v1787_v50, %v283_v39 }
 0x1b4   :  { %656 = vmatmul.f32.gmra.mxu0 %v435_v32  ;;  %685 = vmatmul.f32.gmra.mxu1 %v436_v40  ;;  %v415_v32 = vmul.f32 %v2616_v5, %v385_v8  ;;  %v416_v40 = vmul.f32 %v2617_v9, %v385_v8 }
 0x1b5   :  { %v991_v60 = vadd.f32 %v967_v45, %v937_v15  ;;  %v992_v56 = vadd.f32 %v968_v58, %v938_v16  ;;  %v133_v15 = vmul.f32 %v1793_v53, %v2063_v20  ;;  %v313_v16 = vmul.f32 %v1785_v49, %v283_v39 }
 0x1b6   :  { %v236_v2 = vadd.f32 %v212_v30, %v134_v4 }
 0x1b7   :  { %v2148_v63 = vadd.f32 %v1021_v17, %v991_v60  ;;  %v2150_v29 = vadd.f32 %v1022_v18, %v992_v56  ;;  %v235_v21 = vadd.f32 %v211_v62, %v133_v15 }
 0x1b8   :  { %v338_v57 = vadd.f32 %v314_v41, %v236_v2 }
 0x1b9   :  { %2618 = vst [vmem:[#allocation7_spill] sm:$0xff] %v2148_v63  ;;  %v337_v61 = vadd.f32 %v313_v16, %v235_v21 }
 0x1ba   :  { %2619 = vst [vmem:[#allocation8_spill] sm:$0xff] %v2150_v29  ;;  %v440_v22 = vadd.f32 %v416_v40, %v338_v57 }
 0x1bb   :  { %v439_v38 = vadd.f32 %v415_v32, %v337_v61 }
 0x1bc   :  { %659 = vmatmul.f32.gmra.mxu0 %v437_v33  ;;  %688 = vmatmul.f32.gmra.mxu1 %v438_v0 }
 0x1c4   :  { %662 = vmatmul.f32.gmra.mxu0 %v439_v38  ;;  %691 = vmatmul.f32.gmra.mxu1 %v440_v22 }
 0x1ce   :  { %v1191_v46 = vpop.xlane.xlu1 %1190  ;;  %v1194_v39 = vpop.xlane.xlu2 %1193 }
 0x1cf   :  { %v1199_v20 = vsub.f32 %v1858_v34, %v1191_v46  ;;  %v1200_v1 = vsub.f32 %v1860_v36, %v1191_v46  ;;  %v1201_v45 = vsub.f32 %v1835_v42, %v1194_v39  ;;  %v1202_v17 = vsub.f32 %v1837_v55, %v1194_v39 }
 0x1d1   :  { %v1211_v58 = vmul.f32 1.442695, %v1199_v20  ;;  %v1213_v18 = vmul.f32 1.442695, %v1200_v1  ;;  %v1215_v54 = vmul.f32 1.442695, %v1201_v45 }
 0x1d2   :  { %v1217_v3 = vmul.f32 1.442695, %v1202_v17 }
 0x1d3   :  { %1539 = vpow2.f32 %v1211_v58 }
 0x1d4   :  { %1541 = vpow2.f32 %v1213_v18 }
 0x1d5   :  { %1543 = vpow2.f32 %v1215_v54 }
 0x1d6   :  { %1545 = vpow2.f32 %v1217_v3  ;;  %v62_v8 = vpop.permute.xlu2 %61 }
 0x1d7   :  { %v868_v4 = vmul.f32 %v1765_v28, %v62_v8  ;;  %v117_v45 = vmul.f32 %v1793_v53, %v62_v8  ;;  %v118_v17 = vmul.f32 %v1797_v59, %v62_v8  ;;  %v867_v58 = vmul.f32 %v1763_v27, %v62_v8 }
 0x1d9   :  { %v2168_v60 = vpop.eup %1539 }
 0x1da   :  { %v2170_v56 = vpop.eup %1541 }
 0x1db   :  { %v2172_v34 = vpop.eup %1543  ;;  %v1225_v42 = vadd.f32 %v2170_v56, %v2168_v60 }
 0x1dc   :  { %v2176_v36 = vpop.eup %1545 }
 0x1dd   :  { %1226 = vadd.xlane.f32.xlu0 %v1225_v42  ;;  %v1228_v55 = vadd.f32 %v2176_v36, %v2172_v34  ;;  %v1188_v14 = vpop.xlane.xlu0 %1187 }
 0x1de   :  { %v1197_v19 = vsub.f32 %v1868_v7, %v1188_v14  ;;  %v1198_v62 = vsub.f32 %v1870_v10, %v1188_v14  ;;  %v145_v30 = vpop.permute.xlu2 %144 }
 0x1df   :  { %1229 = vadd.xlane.f32.xlu2 %v1228_v55 }
 0x1e0   :  { %v1207_v33 = vmul.f32 1.442695, %v1197_v19  ;;  %v1209_v0 = vmul.f32 1.442695, %v1198_v62  ;;  %v193_v19 = vmul.f32 %v1767_v31, %v145_v30  ;;  %v194_v62 = vmul.f32 %v1769_v35, %v145_v30 }
 0x1e2   :  { %1547 = vpow2.f32 %v1207_v33 }
 0x1e3   :  { %1549 = vpow2.f32 %v1209_v0 }
 0x1e5   :  { %v1185_v15 = vpop.xlane.xlu0 %1184 }
 0x1e6   :  { %v1195_v16 = vsub.f32 %v1901_v6, %v1185_v15  ;;  %v1196_v41 = vsub.f32 %v1903_v37, %v1185_v15  ;;  %v149_v21 = vpop.permute.xlu1 %148  ;;  %v2186_v61 = vpop.permute.xlu2 %51 }
 0x1e7   :  { %v898_v2 = vmul.f32 %v1761_v24, %v149_v21  ;;  %v195_v18 = vmul.f32 %v1767_v31, %v149_v21  ;;  %v196_v54 = vmul.f32 %v1769_v35, %v149_v21  ;;  %v897_v3 = vmul.f32 %v1759_v23, %v149_v21 }
 0x1e8   :  { %v2188_v7 = vpop.eup %1547  ;;  %v1203_v10 = vmul.f32 1.442695, %v1195_v16  ;;  %v1205_v32 = vmul.f32 1.442695, %v1196_v41  ;;  %v864_v42 = vmul.f32 %v1765_v28, %v2186_v61 }
 0x1e9   :  { %v2190_v57 = vpop.eup %1549  ;;  %v922_v40 = vadd.f32 %v898_v2, %v868_v4  ;;  %v219_v33 = vadd.f32 %v195_v18, %v117_v45  ;;  %v220_v0 = vadd.f32 %v196_v54, %v118_v17  ;;  %v921_v15 = vadd.f32 %v897_v3, %v867_v58 }
 0x1ea   :  { %1551 = vpow2.f32 %v1203_v10  ;;  %v1222_v38 = vadd.f32 %v2190_v57, %v2188_v7  ;;  %v896_v4 = vmul.f32 %v1761_v24, %v145_v30 }
 0x1eb   :  { %1553 = vpow2.f32 %v1205_v32 }
 0x1ec   :  { %1223 = vadd.xlane.f32.xlu1 %v1222_v38 }
 0x1ee   :  { %v247_v37 = vpop.permute.xlu2 %246 }
 0x1ef   :  { %v251_v6 = vpop.permute.xlu1 %250  ;;  %v950_v32 = vmul.f32 %v1791_v52, %v247_v37  ;;  %v295_v58 = vmul.f32 %v1785_v49, %v247_v37  ;;  %v296_v18 = vmul.f32 %v1787_v50, %v247_v37  ;;  %v949_v25 = vmul.f32 %v1789_v51, %v247_v37 }
 0x1f0   :  { %v2194_v22 = vpop.eup %1551  ;;  %v952_v46 = vmul.f32 %v1791_v52, %v251_v6  ;;  %v297_v41 = vmul.f32 %v1785_v49, %v251_v6  ;;  %v298_v21 = vmul.f32 %v1787_v50, %v251_v6  ;;  %v951_v2 = vmul.f32 %v1789_v51, %v251_v6 }
 0x1f1   :  { %v2197_v20 = vpop.eup %1553 }
 0x1f2   :  { %v1219_v1 = vadd.f32 %v2197_v20, %v2194_v22  ;;  %v976_v39 = vadd.f32 %v952_v46, %v922_v40  ;;  %v321_v3 = vadd.f32 %v297_v41, %v219_v33 }
 0x1f4   :  { %1220 = vadd.xlane.f32.xlu2 %v1219_v1  ;;  %v895_v1 = vmul.f32 %v1759_v23, %v145_v30 }
 0x1f6   :  { %v2211_v14 = vpop.permute.xlu2 %46 }
 0x1f8   :  { %v2209_v55 = vpop.permute.xlu1 %140  ;;  %v57_v16 = vpop.permute.xlu0 %56 }
 0x1f9   :  { %v894_v8 = vmul.f32 %v1761_v24, %v2209_v55  ;;  %v115_v40 = vmul.f32 %v1793_v53, %v57_v16  ;;  %v116_v38 = vmul.f32 %v1797_v59, %v57_v16  ;;  %v866_v46 = vmul.f32 %v1765_v28, %v57_v16 }
 0x1fa   :  { %v865_v45 = vmul.f32 %v1763_v27, %v57_v16 }
 0x1fb   :  { %v918_v10 = vadd.f32 %v894_v8, %v864_v42  ;;  %v920_v17 = vadd.f32 %v896_v4, %v866_v46  ;;  %v217_v54 = vadd.f32 %v193_v19, %v115_v40  ;;  %v218_v6 = vadd.f32 %v194_v62, %v116_v38 }
 0x1fc   :  { %v322_v42 = vadd.f32 %v298_v21, %v220_v0  ;;  %v975_v8 = vadd.f32 %v951_v2, %v921_v15  ;;  %v919_v11 = vadd.f32 %v895_v1, %v865_v45 }
 0x1fd   :  { %v2229_v63 = vadd.f32 %v950_v32, %v920_v17  ;;  %v319_v33 = vadd.f32 %v295_v58, %v217_v54  ;;  %v320_v0 = vadd.f32 %v296_v18, %v218_v6 }
 0x1fe   :  { %v243_v29 = vpop.permute.xlu2 %242  ;;  %v973_v38 = vadd.f32 %v949_v25, %v919_v11  ;;  %v862_v25 = vmul.f32 %v1765_v28, %v2211_v14  ;;  %v191_v28 = vmul.f32 %v1767_v31, %v2209_v55 }
 0x1ff   :  { %2620 = vst [vmem:[#allocation14_spill] sm:$0xff] %v2229_v63  ;;  %v948_v30 = vmul.f32 %v1791_v52, %v243_v29 }
 0x201   :  { %v353_v12 = vpop.permute.xlu1 %352  ;;  %v2237_v62 = vadd.f32 %v948_v30, %v918_v10 }
 0x202   :  { %v399_v4 = vmul.f32 %v2616_v5, %v353_v12  ;;  %v400_v16 = vmul.f32 %v2617_v9, %v353_v12  ;;  %v1005_v46 = vmul.f32 %v1781_v47, %v353_v12  ;;  %v1006_v19 = vmul.f32 %v1783_v48, %v353_v12 }
 0x203   :  { %v2247_v2 = vpop.permute.xlu0 %348 }
 0x204   :  { %v2239_v15 = vadd.f32 %v399_v4, %v321_v3  ;;  %v2241_v41 = vadd.f32 %v400_v16, %v322_v42  ;;  %v2243_v37 = vadd.f32 %v1005_v46, %v975_v8  ;;  %v2245_v21 = vadd.f32 %v1006_v19, %v976_v39  ;;  %2622 = vst [vmem:[#allocation16_spill] sm:$0xff] %v2247_v2 }
 0x205   :  { %v397_v32 = vmul.f32 %v2616_v5, %v2247_v2  ;;  %v398_v12 = vmul.f32 %v2617_v9, %v2247_v2  ;;  %v1003_v1 = vmul.f32 %v1781_v47, %v2247_v2  ;;  %v113_v16 = vmul.f32 %v1793_v53, %v2186_v61 }
 0x206   :  { %2621 = vst [vmem:[#allocation15_spill] sm:$0xff] %v2245_v21  ;;  %v477_v10 = vrot.slane %v2239_v15, 4  ;;  %v483_v40 = vrot.slane %v2241_v41, 4  ;;  %v1083_v18 = vrot.slane %v2243_v37, 4  ;;  %v345_v2 = vpop.permute.xlu2 %344 }
 0x207   :  { %v2257_v45 = vadd.f32 %v397_v32, %v319_v33  ;;  %v2259_v39 = vadd.f32 %v398_v12, %v320_v0  ;;  %v2265_v42 = vadd.f32 %v1003_v1, %v973_v38  ;;  %v114_v0 = vmul.f32 %v1797_v59, %v2186_v61 }
 0x208   :  { %v478_v17 = vmax.f32 %v2239_v15, %v477_v10  ;;  %v484_v58 = vmax.f32 %v2241_v41, %v483_v40  ;;  %v1084_v30 = vmax.f32 %v2243_v37, %v1083_v18  ;;  %v192_v32 = vmul.f32 %v1769_v35, %v2209_v55 }
 0x209   :  { %v465_v54 = vrot.slane %v2257_v45, 4  ;;  %v471_v11 = vrot.slane %v2259_v39, 4  ;;  %v1071_v12 = vrot.slane %v2265_v42, 4  ;;  %v863_v10 = vmul.f32 %v1763_v27, %v2186_v61 }
 0x20a   :  { %v479_v6 = vrot.slane %v478_v17, 2  ;;  %v485_v3 = vrot.slane %v484_v58, 2  ;;  %v137_v4 = vpop.permute.xlu1 %136  ;;  %v893_v40 = vmul.f32 %v1759_v23, %v2209_v55  ;;  %v111_v18 = vmul.f32 %v1793_v53, %v2211_v14 }
 0x20b   :  { %v892_v19 = vmul.f32 %v1761_v24, %v137_v4  ;;  %v466_v33 = vmax.f32 %v2257_v45, %v465_v54  ;;  %v472_v38 = vmax.f32 %v2259_v39, %v471_v11  ;;  %v112_v54 = vmul.f32 %v1797_v59, %v2211_v14 }
 0x20c   :  { %v480_v8 = vmax.f32 %v478_v17, %v479_v6  ;;  %v486_v46 = vmax.f32 %v484_v58, %v485_v3  ;;  %v1085_v17 = vrot.slane %v1084_v30, 2  ;;  %v215_v3 = vadd.f32 %v191_v28, %v113_v16 }
 0x20d   :  { %v916_v24 = vadd.f32 %v892_v19, %v862_v25  ;;  %v467_v6 = vrot.slane %v466_v33, 2  ;;  %v216_v21 = vadd.f32 %v192_v32, %v114_v0  ;;  %v293_v61 = vmul.f32 %v1785_v49, %v243_v29 }
 0x20e   :  { %v481_v1 = vrot.slane %v480_v8, 1  ;;  %v487_v58 = vrot.slane %v486_v46, 1  ;;  %v1072_v63 = vmax.f32 %v2265_v42, %v1071_v12  ;;  %v917_v55 = vadd.f32 %v893_v40, %v863_v10 }
 0x20f   :  { %v294_v25 = vmul.f32 %v1787_v50, %v243_v29  ;;  %v947_v11 = vmul.f32 %v1789_v51, %v243_v29  ;;  %v473_v19 = vrot.slane %v472_v38, 2  ;;  %v1086_v13 = vmax.f32 %v1084_v30, %v1085_v17 }
 0x210   :  { %v482_v26 = vmax.f32 %v480_v8, %v481_v1  ;;  %v189_v53 = vmul.f32 %v1767_v31, %v137_v4  ;;  %v190_v59 = vmul.f32 %v1769_v35, %v137_v4  ;;  %v488_v43 = vmax.f32 %v486_v46, %v487_v58 }
 0x211   :  { %v861_v16 = vmul.f32 %v1763_v27, %v2211_v14  ;;  %v891_v0 = vmul.f32 %v1759_v23, %v137_v4  ;;  %v468_v32 = vmax.f32 %v466_v33, %v467_v6  ;;  %v317_v12 = vadd.f32 %v293_v61, %v215_v3 }
 0x212   :  { %v1073_v10 = vrot.slane %v1072_v63, 2  ;;  %v395_v29 = vmul.f32 %v2616_v5, %v345_v2  ;;  %v318_v40 = vadd.f32 %v294_v25, %v216_v21  ;;  %v971_v44 = vadd.f32 %v947_v11, %v917_v55 }
 0x213   :  { %v239_v28 = vpop.permute.xlu1 %238  ;;  %v474_v30 = vmax.f32 %v472_v38, %v473_v19  ;;  %v495_v31 = vsub.f32 %v2239_v15, %v482_v26  ;;  %v1087_v35 = vrot.slane %v1086_v13, 1  ;;  %v213_v46 = vadd.f32 %v189_v53, %v111_v18 }
 0x214   :  { %v946_v8 = vmul.f32 %v1791_v52, %v239_v28  ;;  %v214_v1 = vadd.f32 %v190_v59, %v112_v54  ;;  %v496_v27 = vsub.f32 %v2241_v41, %v488_v43  ;;  %v915_v14 = vadd.f32 %v891_v0, %v861_v16 }
 0x215   :  { %v469_v4 = vrot.slane %v468_v32, 1  ;;  %v291_v33 = vmul.f32 %v1785_v49, %v239_v28  ;;  %v1074_v17 = vmax.f32 %v1072_v63, %v1073_v10  ;;  %v396_v58 = vmul.f32 %v2617_v9, %v345_v2 }
 0x216   :  { %v970_v23 = vadd.f32 %v946_v8, %v916_v24  ;;  %v2306_v21 = vadd.f32 %v395_v29, %v317_v12  ;;  %v292_v52 = vmul.f32 %v1787_v50, %v239_v28  ;;  %v475_v38 = vrot.slane %v474_v30, 1 }
 0x217   :  { %v1001_v26 = vmul.f32 %v1781_v47, %v345_v2  ;;  %v1002_v15 = vmul.f32 %v1783_v48, %v345_v2  ;;  %v509_v18 = vmul.f32 1.442695, %v495_v31  ;;  %v945_v43 = vmul.f32 %v1789_v51, %v239_v28 }
 0x218   :  { %v2312_v41 = vadd.f32 %v396_v58, %v318_v40  ;;  %v453_v24 = vrot.slane %v2306_v21, 4  ;;  %v2315_v49 = vmax.f32 %v1086_v13, %v1087_v35  ;;  %v470_v63 = vmax.f32 %v468_v32, %v469_v4 }
 0x219   :  { %v2317_v54 = vadd.f32 %v1001_v26, %v971_v44  ;;  %v2320_v6 = vadd.f32 %v1002_v15, %v2237_v62  ;;  %v511_v50 = vmul.f32 1.442695, %v496_v27  ;;  %v315_v3 = vadd.f32 %v291_v33, %v213_v46 }
 0x21a   :  { %v1075_v61 = vrot.slane %v1074_v17, 1  ;;  %v454_v2 = vmax.f32 %v2306_v21, %v453_v24  ;;  %v316_v55 = vadd.f32 %v292_v52, %v214_v1  ;;  %v476_v25 = vmax.f32 %v474_v30, %v475_v38 }
 0x21b   :  { %v459_v51 = vrot.slane %v2312_v41, 4  ;;  %v1059_v11 = vrot.slane %v2317_v54, 4  ;;  %1555 = vpow2.f32 %v509_v18  ;;  %v969_v13 = vadd.f32 %v945_v43, %v915_v14 }
 0x21c   :  { %v455_v53 = vrot.slane %v454_v2, 2  ;;  %v493_v62 = vsub.f32 %v2257_v45, %v470_v63  ;;  %1557 = vpow2.f32 %v511_v50  ;;  %v494_v10 = vsub.f32 %v2259_v39, %v476_v25 }
 0x21d   :  { %v341_v19 = vpop.permute.xlu1 %340  ;;  %v460_v59 = vmax.f32 %v2312_v41, %v459_v51  ;;  %v1060_v16 = vmax.f32 %v2317_v54, %v1059_v11  ;;  %v1076_v52 = vmax.f32 %v1074_v17, %v1075_v61  ;;  %v1101_v50 = vsub.f32 %v2243_v37, %v2315_v49 }
 0x21e   :  { %v393_v44 = vmul.f32 %v2616_v5, %v341_v19  ;;  %v394_v0 = vmul.f32 %v2617_v9, %v341_v19  ;;  %v456_v28 = vmax.f32 %v454_v2, %v455_v53  ;;  %v999_v12 = vmul.f32 %v1781_v47, %v341_v19 }
 0x21f   :  { %v461_v29 = vrot.slane %v460_v59, 2  ;;  %v1061_v40 = vrot.slane %v1060_v16, 2  ;;  %v1000_v30 = vmul.f32 %v1783_v48, %v341_v19  ;;  %v505_v9 = vmul.f32 1.442695, %v493_v62 }
 0x220   :  { %v2330_v32 = vadd.f32 %v393_v44, %v315_v3  ;;  %v2334_v8 = vadd.f32 %v394_v0, %v316_v55  ;;  %v457_v5 = vrot.slane %v456_v28, 1  ;;  %v2338_v31 = vadd.f32 %v999_v12, %v969_v13 }
 0x221   :  { %v462_v35 = vmax.f32 %v460_v59, %v461_v29  ;;  %v1062_v46 = vmax.f32 %v1060_v16, %v1061_v40  ;;  %v2341_v27 = vpop.eup %1555  ;;  %v2344_v4 = vadd.f32 %v1000_v30, %v970_v23  ;;  %v507_v58 = vmul.f32 1.442695, %v494_v10 }
 0x222   :  { %v441_v45 = vrot.slane %v2330_v32, 4  ;;  %v447_v1 = vrot.slane %v2334_v8, 4  ;;  %v458_v14 = vmax.f32 %v456_v28, %v457_v5  ;;  %v1047_v33 = vrot.slane %v2338_v31, 4  ;;  %v2348_v15 = vpop.eup %1557 }
 0x223   :  { %v463_v38 = vrot.slane %v462_v35, 1  ;;  %v1063_v43 = vrot.slane %v1062_v46, 1  ;;  %1559 = vpow2.f32 %v505_v9  ;;  %v1099_v51 = vsub.f32 %v2265_v42, %v1076_v52 }
 0x224   :  { %v442_v39 = vmax.f32 %v2330_v32, %v441_v45  ;;  %v448_v26 = vmax.f32 %v2334_v8, %v447_v1  ;;  %v491_v18 = vsub.f32 %v2306_v21, %v458_v14  ;;  %v1048_v63 = vmax.f32 %v2338_v31, %v1047_v33 }
 0x225   :  { %v464_v23 = vmax.f32 %v462_v35, %v463_v38  ;;  %1561 = vpow2.f32 %v507_v58  ;;  %v1064_v19 = vmax.f32 %v1062_v46, %v1063_v43  ;;  %v1115_v44 = vmul.f32 1.442695, %v1101_v50 }
 0x226   :  { %v443_v24 = vrot.slane %v442_v39, 2  ;;  %v449_v3 = vrot.slane %v448_v26, 2  ;;  %v501_v17 = vmul.f32 1.442695, %v491_v18  ;;  %v1049_v25 = vrot.slane %v1048_v63, 2 }
 0x227   :  { %v492_v11 = vsub.f32 %v2312_v41, %v464_v23  ;;  %v1111_v16 = vmul.f32 1.442695, %v1099_v51  ;;  %v549_v0 = vrot.slane %v2341_v27, 4  ;;  %v1097_v42 = vsub.f32 %v2317_v54, %v1064_v19 }
 0x228   :  { %v444_v61 = vmax.f32 %v442_v39, %v443_v24  ;;  %v450_v21 = vmax.f32 %v448_v26, %v449_v3  ;;  %v1050_v53 = vmax.f32 %v1048_v63, %v1049_v25  ;;  %1563 = vpow2.f32 %v501_v17 }
 0x229   :  { %v654_v2 = vpop.f32.mrf.mxu0  ;;  %v683_v55 = vpop.f32.mrf.mxu1  ;;  %v503_v37 = vmul.f32 1.442695, %v492_v11  ;;  %v550_v5 = vadd.f32 %v2341_v27, %v549_v0  ;;  %v555_v45 = vrot.slane %v2348_v15, 4  ;;  %v1107_v14 = vmul.f32 1.442695, %v1097_v42 }
 0x22a   :  { %v445_v13 = vrot.slane %v444_v61, 1  ;;  %v451_v62 = vrot.slane %v450_v21, 1  ;;  %v1051_v59 = vrot.slane %v1050_v53, 1  ;;  %v2357_v28 = vpop.eup %1559  ;;  %v2383_v63 = vadd.f32 %v683_v55, %v654_v2 }
 0x22b   :  { %1565 = vpow2.f32 %v503_v37  ;;  %v2367_v30 = vpop.eup %1561  ;;  %v551_v54 = vrot.slane %v550_v5, 2  ;;  %v537_v1 = vrot.slane %v2357_v28, 4 }
 0x22c   :  { %v446_v49 = vmax.f32 %v444_v61, %v445_v13  ;;  %v452_v41 = vmax.f32 %v450_v21, %v451_v62  ;;  %1567 = vpow2.f32 %v1115_v44  ;;  %v1052_v10 = vmax.f32 %v1050_v53, %v1051_v59 }
 0x22d   :  { %1569 = vpow2.f32 %v1111_v16  ;;  %v552_v52 = vadd.f32 %v551_v54, %v550_v5  ;;  %v543_v26 = vrot.slane %v2367_v30, 4 }
 0x22e   :  { %v489_v12 = vsub.f32 %v2330_v32, %v446_v49  ;;  %v490_v9 = vsub.f32 %v2334_v8, %v452_v41  ;;  %v2370_v46 = vpop.eup %1563  ;;  %v556_v32 = vadd.f32 %v2348_v15, %v555_v45  ;;  %v1095_v58 = vsub.f32 %v2338_v31, %v1052_v10 }
 0x22f   :  { %v538_v8 = vadd.f32 %v2357_v28, %v537_v1  ;;  %v525_v18 = vrot.slane %v2370_v46, 4  ;;  %v553_v50 = vrot.slane %v552_v52, 1  ;;  %v544_v31 = vadd.f32 %v2367_v30, %v543_v26 }
 0x230   :  { %v497_v35 = vmul.f32 1.442695, %v489_v12  ;;  %v499_v39 = vmul.f32 1.442695, %v490_v9  ;;  %v557_v38 = vrot.slane %v556_v32, 2 }
 0x231   :  { %v2361_v29 = vpop.f32.mrf.mxu0  ;;  %v2363_v40 = vpop.f32.mrf.mxu1  ;;  %v539_v3 = vrot.slane %v538_v8, 2  ;;  %v526_v17 = vadd.f32 %v2370_v46, %v525_v18  ;;  %v2390_v51 = vmul.f32 1.442695, %v1095_v58  ;;  %v554_v19 = vadd.f32 %v553_v50, %v552_v52 }
 0x232   :  { %1571 = vpow2.f32 %v497_v35  ;;  %v2374_v33 = vpop.eup %1565  ;;  %v558_v23 = vadd.f32 %v557_v38, %v556_v32  ;;  %v545_v53 = vrot.slane %v544_v31, 2 }
 0x233   :  { %1573 = vpow2.f32 %v499_v39  ;;  %v531_v43 = vrot.slane %v2374_v33, 4  ;;  %v2381_v24 = vpop.eup %1567  ;;  %v540_v55 = vadd.f32 %v539_v3, %v538_v8  ;;  %v527_v44 = vrot.slane %v526_v17, 2 }
 0x234   :  { %v2388_v25 = vpop.eup %1569  ;;  %1575 = vpow2.f32 %v1107_v14  ;;  %v559_v13 = vrot.slane %v558_v23, 1  ;;  %v1155_v37 = vrot.slane %v2381_v24, 4  ;;  %v546_v41 = vadd.f32 %v545_v53, %v544_v31 }
 0x235   :  { %v532_v61 = vadd.f32 %v2374_v33, %v531_v43  ;;  %1577 = vrcp.f32 %v554_v19  ;;  %v541_v42 = vrot.slane %v540_v55, 1  ;;  %v528_v12 = vadd.f32 %v527_v44, %v526_v17 }
 0x236   :  { %v560_v49 = vadd.f32 %v559_v13, %v558_v23  ;;  %v547_v35 = vrot.slane %v546_v41, 1  ;;  %v1156_v32 = vadd.f32 %v2381_v24, %v1155_v37  ;;  %v1143_v52 = vrot.slane %v2388_v25, 4  ;;  %v2408_v23 = vld [vmem:[%s2574_s1 + $0x18] sm:$0xff] }
 0x237   :  { %v533_v62 = vrot.slane %v532_v61, 2  ;;  %v542_v9 = vadd.f32 %v541_v42, %v540_v55  ;;  %v529_v54 = vrot.slane %v528_v12, 1  ;;  %v2415_v55 = vld [vmem:[%s2574_s1 + $0x10] sm:$0xff] }
 0x238   :  { %v2392_v2 = vpop.eup %1571  ;;  %1579 = vrcp.f32 %v560_v49  ;;  %v548_v38 = vadd.f32 %v547_v35, %v546_v41  ;;  %v1157_v26 = vrot.slane %v1156_v32, 2  ;;  %v687_v49 = vadd.f32 %v2363_v40, %v2361_v29  ;;  %v2431_v40 = vld [vmem:[%s2574_s1] sm:$0xff] }
 0x239   :  { %v660_v11 = vpop.f32.mrf.mxu0  ;;  %v689_v21 = vpop.f32.mrf.mxu1  ;;  %v513_v59 = vrot.slane %v2392_v2, 4  ;;  %v534_v10 = vadd.f32 %v533_v62, %v532_v61  ;;  %1581 = vrcp.f32 %v542_v9  ;;  %v530_v8 = vadd.f32 %v529_v54, %v528_v12 }
 0x23a   :  { %v2396_v16 = vpop.eup %1573  ;;  %v690_v0 = vadd.f32 %v689_v21, %v660_v11  ;;  %v1144_v61 = vadd.f32 %v2388_v25, %v1143_v52  ;;  %1583 = vrcp.f32 %v548_v38  ;;  %v1158_v19 = vadd.f32 %v1157_v26, %v1156_v32 }
 0x23b   :  { %v514_v5 = vadd.f32 %v2392_v2, %v513_v59  ;;  %v519_v45 = vrot.slane %v2396_v16, 4  ;;  %v2401_v1 = vpop.eup %1575  ;;  %v535_v14 = vrot.slane %v534_v10, 1  ;;  %1585 = vrcp.f32 %v530_v8  ;;  %v2423_v59 = vld [vmem:[%s2574_s1 + $0x8] sm:$0xff] }
 0x23c   :  { %v1578_v18 = vpop.eup %1577  ;;  %v1145_v37 = vrot.slane %v1144_v61, 2  ;;  %v697_v29 = vmul.f32 %v690_v0, %v2415_v55  ;;  %v695_v0 = vmul.f32 %v2383_v63, %v2431_v40 }
 0x23d   :  { %v515_v39 = vrot.slane %v514_v5, 2  ;;  %v520_v58 = vadd.f32 %v2396_v16, %v519_v45  ;;  %v536_v3 = vadd.f32 %v535_v14, %v534_v10  ;;  %v575_v21 = vmul.f32 %v1578_v18, %v2341_v27 }
 0x23e   :  { %v1580_v13 = vpop.eup %1579  ;;  %v1159_v27 = vrot.slane %v1158_v19, 1  ;;  %v1146_v12 = vadd.f32 %v1145_v37, %v1144_v61  ;;  %v1131_v10 = vrot.slane %v2401_v1, 4  ;;  %v696_v14 = vmul.f32 %v687_v49, %v2423_v59 }
 0x23f   :  { %v516_v31 = vadd.f32 %v515_v39, %v514_v5  ;;  %v521_v17 = vrot.slane %v520_v58, 2  ;;  %743 = vmatpush.msra.mxu3 %v575_v21  ;;  %1587 = vrcp.f32 %v536_v3  ;;  %v1582_v5 = vpop.eup %1581  ;;  %v576_v38 = vmul.f32 %v1580_v13, %v2348_v15 }
 0x240   :  { %1589 = vpow2.f32 %v2390_v51  ;;  %v1160_v45 = vadd.f32 %v1159_v27, %v1158_v19  ;;  %v573_v9 = vmul.f32 %v1582_v5, %v2357_v28  ;;  %v1147_v54 = vrot.slane %v1146_v12, 1  ;;  %v1584_v32 = vpop.eup %1583  ;;  %v2441_v28 = vld [vmem:[%s2576_s3] sm:$0xf] }
 0x241   :  { %v663_v43 = vpop.f32.mrf.mxu0  ;;  %v692_v50 = vpop.f32.mrf.mxu1  ;;  %v517_v53 = vrot.slane %v516_v31, 1  ;;  %v522_v44 = vadd.f32 %v521_v17, %v520_v58  ;;  %v1132_v51 = vadd.f32 %v2401_v1, %v1131_v10  ;;  %v574_v63 = vmul.f32 %v1584_v32, %v2367_v30 }
 0x242   :  { %v693_v11 = vadd.f32 %v692_v50, %v663_v43  ;;  %v1586_v39 = vpop.eup %1585  ;;  %744 = vmatpush.msra.mxu3 %v573_v9  ;;  %v1148_v58 = vadd.f32 %v1147_v54, %v1146_v12  ;;  %v37_v54 = vld [vmem:[%s2577_s4] sm:$0xf]  ;;  %s1668_s4 = smov [#allocation2]  }
 0x243   :  { %v518_v42 = vadd.f32 %v517_v53, %v516_v31  ;;  %v523_v41 = vrot.slane %v522_v44, 1  ;;  %v571_v8 = vmul.f32 %v1586_v39, %v2370_v46  ;;  %v1133_v26 = vrot.slane %v1132_v51, 2  ;;  %725 = vperm.xlu0 %1513, %v37_v54  }
 0x244   :  { %v698_v62 = vmul.f32 %v693_v11, %v2408_v23 }
 0x245   :  { %1591 = vrcp.f32 %v518_v42  ;;  %v524_v35 = vadd.f32 %v523_v41, %v522_v44  ;;  %v1588_v52 = vpop.eup %1587  ;;  %745 = vmatpush.msra.mxu3 %v571_v8  ;;  %v1134_v43 = vadd.f32 %v1133_v26, %v1132_v51  ;;  %v2627_v51 = vld [vmem:[#allocation13_spill] sm:$0xff]  ;;  %v2630_v26 = vld [vmem:[#allocation7_spill] sm:$0xff] }
 0x246   :  { %715 = vmatpush.msra.mxu2 %v698_v62  ;;  %1593 = vrcp.f32 %v1160_v45  ;;  %v1590_v18 = vpop.eup %1589  ;;  %v572_v31 = vmul.f32 %v1588_v52, %v2374_v33  ;;  %v1019_v39 = vmul.f32 %v1781_v47, %v2627_v51 }
 0x247   :  { %1595 = vrcp.f32 %v524_v35  ;;  %v1135_v17 = vrot.slane %v1134_v43, 1  ;;  %v1119_v21 = vrot.slane %v1590_v18, 4 }
 0x248   :  { %716 = vmatpush.msra.mxu2 %v697_v29  ;;  %1597 = vrcp.f32 %v1148_v58  ;;  %v2628_v58 = vld [vmem:[#allocation11_spill] sm:$0xff] }
 0x249   :  { %v1136_v11 = vadd.f32 %v1135_v17, %v1134_v43  ;;  %v1120_v33 = vadd.f32 %v1590_v18, %v1119_v21  ;;  %v1043_v52 = vadd.f32 %v1019_v39, %v2628_v58 }
 0x24a   :  { %717 = vmatpush.msra.mxu2 %v696_v14  ;;  %v2626_v14 = vld [vmem:[#allocation10_spill] sm:$0xff] }
 0x24b   :  { %v1592_v50 = vpop.eup %1591  ;;  %1599 = vrcp.f32 %v1136_v11 }
 0x24c   :  { %718 = vmatpush.msra.mxu2 %v695_v0  ;;  %v1594_v3 = vpop.eup %1593  ;;  %v569_v15 = vmul.f32 %v1592_v50, %v2392_v2  ;;  %v1121_v2 = vrot.slane %v1120_v33, 2  ;;  %v1020_v0 = vmul.f32 %v1783_v48, %v2627_v51  ;;  %v2633_v50 = vld [vmem:[#allocation14_spill] sm:$0xff] }
 0x24d   :  { %1455 = vmatmul.msk.f32.vlgmr.msra.gmra.mxu2 %vm699_vm0, %v2441_v28  ;;  %v1596_v46 = vpop.eup %1595  ;;  %v1181_v61 = vmul.f32 %v1594_v3, %v2381_v24 }
 0x24e   :  { %763 = vmatpush.msrb.mxu2 %v576_v38  ;;  %746 = vmatpush.msra.mxu3 %v569_v15  ;;  %v570_v30 = vmul.f32 %v1596_v46, %v2396_v16  ;;  %v1598_v19 = vpop.eup %1597  ;;  %v1122_v24 = vadd.f32 %v1121_v2, %v1120_v33  ;;  %v2629_v38 = vld [vmem:[#allocation12_spill] sm:$0xff]  ;;  %v1065_v46 = vrot.slane %v2320_v6, 4 }
 0x24f   :  { %1340 = vmatpush.msrb.mxu1 %v1181_v61  ;;  %v1179_v44 = vmul.f32 %v1598_v19, %v2388_v25  ;;  %v1044_v8 = vadd.f32 %v1020_v0, %v2629_v38 }
 0x250   :  { %764 = vmatpush.msrb.mxu2 %v574_v63  ;;  %v1227_v13 = vpop.xlane.xlu0 %1226  ;;  %v1123_v49 = vrot.slane %v1122_v24, 1  ;;  %v2632_v63 = vld [vmem:[#allocation16_spill] sm:$0xff]  ;;  %v1066_v21 = vmax.f32 %v2320_v6, %v1065_v46 }
 0x251   :  { %1341 = vmatpush.msrb.mxu1 %v1179_v44  ;;  %v1600_v37 = vpop.eup %1599  ;;  %v1004_v43 = vmul.f32 %v1783_v48, %v2632_v63 }
 0x252   :  { %v1230_v53 = vpop.xlane.xlu2 %1229  ;;  %765 = vmatpush.msrb.mxu2 %v572_v31  ;;  %v1177_v62 = vmul.f32 %v1600_v37, %v2401_v1  ;;  %v1124_v41 = vadd.f32 %v1123_v49, %v1122_v24  ;;  %v2634_v31 = vld [vmem:[#allocation15_spill] sm:$0xff]  ;;  %v1067_v48 = vrot.slane %v1066_v21, 2 }
 0x253   :  { %1601 = vrcp.f32 %v1230_v53  ;;  %v1028_v3 = vadd.f32 %v1004_v43, %v2633_v50  ;;  %v1089_v47 = vrot.slane %v2634_v31, 4 }
 0x254   :  { %766 = vmatpush.msrb.mxu2 %v570_v30  ;;  %1603 = vrcp.f32 %v1227_v13  ;;  %1342 = vmatpush.msrb.mxu1 %v1177_v62  ;;  %v1053_v30 = vrot.slane %v2344_v4, 4  ;;  %v1068_v24 = vmax.f32 %v1066_v21, %v1067_v48 }
 0x255   :  { %1605 = vrcp.f32 %v1124_v41  ;;  %v1077_v15 = vrot.slane %v1028_v3, 4  ;;  %v1090_v17 = vmax.f32 %v2634_v31, %v1089_v47 }
 0x256   :  { %v1054_v13 = vmax.f32 %v2344_v4, %v1053_v30  ;;  %v1069_v62 = vrot.slane %v1068_v24, 1 }
 0x257   :  { %v1078_v61 = vmax.f32 %v1028_v3, %v1077_v15  ;;  %v1091_v11 = vrot.slane %v1090_v17, 2 }
 0x258   :  { %v1055_v33 = vrot.slane %v1054_v13, 2 }
 0x259   :  { %v1602_v16 = vpop.eup %1601  ;;  %v1079_v19 = vrot.slane %v1078_v61, 2  ;;  %v1092_v53 = vmax.f32 %v1090_v17, %v1091_v11 }
 0x25a   :  { %v1241_v27 = vmul.f32 %v1602_v16, %v2172_v34  ;;  %v1242_v42 = vmul.f32 %v1602_v16, %v2176_v36  ;;  %v1604_v12 = vpop.eup %1603  ;;  %v1056_v49 = vmax.f32 %v1054_v13, %v1055_v33 }
 0x25b   :  { %v1239_v25 = vmul.f32 %v1604_v12, %v2168_v60  ;;  %v1240_v10 = vmul.f32 %v1604_v12, %v2170_v56  ;;  %v1606_v29 = vpop.eup %1605  ;;  %v1080_v44 = vmax.f32 %v1078_v61, %v1079_v19  ;;  %v1093_v2 = vrot.slane %v1092_v53, 1 }
 0x25c   :  { %1255 = vmatpush.xpose.msrb.mxu3 %v1241_v27  ;;  %1284 = vmatpush.xpose.msra.mxu2 %v1242_v42  ;;  %v1175_v1 = vmul.f32 %v1606_v29, %v1590_v18  ;;  %v2631_v18 = vld [vmem:[#allocation8_spill] sm:$0xff]  ;;  %v1667_v42 = vmov 4.0   ;;  %v1057_v41 = vrot.slane %v1056_v49, 1 }
 0x25d   :  { %v1081_v37 = vrot.slane %v1080_v44, 1  ;;  %v1094_v16 = vmax.f32 %v1092_v53, %v1093_v2 }
 0x25e   :  { %1343 = vmatpush.msrb.mxu1 %v1175_v1 }
 0x25f   :  { %v1224_v5 = vpop.xlane.xlu1 %1223  ;;  %v1082_v27 = vmax.f32 %v1080_v44, %v1081_v37  ;;  %v1102_v12 = vsub.f32 %v2634_v31, %v1094_v16 }
 0x260   :  { %1256 = vmatpush.xpose.msrb.mxu3 %v1239_v25  ;;  %1285 = vmatpush.xpose.msra.mxu2 %v1240_v10  ;;  %1607 = vrcp.f32 %v1224_v5  ;;  %v1070_v25 = vmax.f32 %v1068_v24, %v1069_v62  ;;  %v1058_v5 = vmax.f32 %v1056_v49, %v1057_v41 }
 0x261   :  { %v1100_v10 = vsub.f32 %v1028_v3, %v1082_v27  ;;  %v1117_v1 = vmul.f32 1.442695, %v1102_v12 }
 0x266   :  { %v1608_v34 = vpop.eup %1607 }
 0x267   :  { %v1221_v45 = vpop.xlane.xlu2 %1220  ;;  %v1237_v36 = vmul.f32 %v1608_v34, %v2188_v7  ;;  %v1238_v9 = vmul.f32 %v1608_v34, %v2190_v57  ;;  %v38_v7 = vld [vmem:[%s2578_s5] sm:$0xf]  ;;  %v2623_v57 = vld [vmem:[#allocation6_spill] sm:$0xff]  ;;  %v1098_v34 = vsub.f32 %v2320_v6, %v1070_v25  ;;  %s1441_s5 = sshll.u32 %s1668_s4, 4  ;;  %s1442_s5 = int_to_ptr.vmem [resolvable:$true] %s1441_s5 }
 0x268   :  { %1609 = vrcp.f32 %v1221_v45  ;;  %841 = vperm.xlu1 %1514, %v38_v7   ;;  %v1113_v45 = vmul.f32 1.442695, %v1100_v10 }
 0x269   :  { %1257 = vmatpush.xpose.msrb.mxu3 %v1237_v36  ;;  %1286 = vmatpush.xpose.msra.mxu2 %v1238_v9  ;;  %1611 = vrcp.f32 %v1667_v42  ;;  %v1096_v36 = vsub.f32 %v2344_v4, %v1058_v5 }
 0x26a   :  { %1613 = vpow2.f32 %v1117_v1 }
 0x26b   :  { %1615 = vpow2.f32 %v1113_v45 }
 0x26e   :  { %v1610_v35 = vpop.eup %1609 }
 0x26f   :  { %v1235_v60 = vmul.f32 %v1610_v35, %v2194_v22  ;;  %v1236_v56 = vmul.f32 %v1610_v35, %v2197_v20  ;;  %v2624_v22 = vld [vmem:[#allocation5_spill] sm:$0xff]  ;;  %v1612_v29 = vpop.eup %1611 }
 0x270   :  { %v2625_v20 = vld [vmem:[#allocation9_spill] sm:$0xff]  ;;  %v787_v9 = vmul.f32 4.0, %v1612_v29  ;;  %v2500_v51 = vpop.eup %1613  ;;  %vm791_vm2 = vweird.f32 %v1612_v29 }
 0x271   :  { %1258 = vmatpush.xpose.msrb.mxu3 %v1235_v60  ;;  %1287 = vmatpush.xpose.msra.mxu2 %v1236_v56  ;;  %v1109_v60 = vmul.f32 1.442695, %v1098_v34  ;;  %v2502_v0 = vpop.eup %1615  ;;  %v1161_v63 = vrot.slane %v2500_v51, 4 }
 0x272   :  { %v1149_v47 = vrot.slane %v2502_v0, 4 }
 0x273   :  { %1617 = vpow2.f32 %v1109_v60  ;;  %v1162_v61 = vadd.f32 %v2500_v51, %v1161_v63 }
 0x274   :  { %v1150_v13 = vadd.f32 %v2502_v0, %v1149_v47 }
 0x275   :  { %v1163_v24 = vrot.slane %v1162_v61, 2 }
 0x276   :  { %v1151_v62 = vrot.slane %v1150_v13, 2 }
 0x277   :  { %v1164_v12 = vadd.f32 %v1163_v24, %v1162_v61 }
 0x279   :  { %v2509_v43 = vpop.eup %1617  ;;  %v1165_v60 = vrot.slane %v1164_v12, 1 }
 0x27a   :  { %v1137_v30 = vrot.slane %v2509_v43, 4 }
 0x27c   :  { %v1138_v37 = vadd.f32 %v2509_v43, %v1137_v30 }
 0x27e   :  { %v1139_v25 = vrot.slane %v1138_v37, 2 }
 0x2b5   :  { %v2494_v35 = vpop.permute.xlu0 %725 }
 0x2d0   :  { %v720_v32 = vpop.f32.mrf.mxu2 }
 0x2d1   :  { %1456 = vmatmul.msk.f32.vlgmr.msra.gmra.mxu3 %vm699_vm0, %v720_v32  ;;  %1457 = vmatmul.msk.f32.vlgmr.msrb.gmra.mxu2 %vm699_vm0, %v720_v32  ;;  %v1105_v32 = vmul.f32 1.442695, %v1096_v36 }
 0x2d3   :  { %1619 = vpow2.f32 %v1105_v32 }
 0x2d9   :  { %1259 = vmatmul.f32.vlgmr.msrb.gmra.mxu3 %v2623_v57  ;;  %1288 = vmatmul.f32.vlgmr.msra.gmra.mxu2 %v2624_v22  ;;  %v788_v57 = vsub.f32 1.0, %v787_v9  ;;  %v2512_v15 = vpop.eup %1619 }
 0x2da   :  { %v1125_v53 = vrot.slane %v2512_v15, 4 }
 0x2db   :  { %v789_v39 = vmul.f32 %v1612_v29, %v788_v57 }
 0x2dc   :  { %v1126_v27 = vadd.f32 %v2512_v15, %v1125_v53 }
 0x2dd   :  { %v790_v50 = vadd.f32 %v1612_v29, %v789_v39 }
 0x2de   :  { %v1127_v1 = vrot.slane %v1126_v27, 2 }
 0x2df   :  { %v2516_v11 = vsel %vm791_vm2, %v1612_v29, %v790_v50  ;;  %v1152_v29 = vadd.f32 %v1151_v62, %v1150_v13 }
 0x2e0   :  { %v1128_v57 = vadd.f32 %v1127_v1, %v1126_v27 }
 0x2e1   :  { %1262 = vmatmul.f32.gmra.mxu3 %v2625_v20  ;;  %1291 = vmatmul.f32.gmra.mxu2 %v2626_v14 }
 0x2e9   :  { %1265 = vmatmul.f32.gmra.mxu3 %v1043_v52  ;;  %1294 = vmatmul.f32.gmra.mxu2 %v1044_v8 }
 0x2f1   :  { %1268 = vmatmul.f32.gmra.mxu3 %v2630_v26  ;;  %1297 = vmatmul.f32.gmra.mxu2 %v2631_v18 }
 0x354   :  { %v748_v56 = vpop.f32.mrf.mxu3  ;;  %v768_v54 = vpop.f32.mrf.mxu2 }
 0x355   :  { %v749_v7 = vadd.f32 %v748_v56, %v2494_v35  ;;  %v769_v22 = vadd.f32 %v768_v54, %v2494_v35  ;;  %v1140_v56 = vadd.f32 %v1139_v25, %v1138_v37 }
 0x357   :  { %v772_v6 = vsel %vm771_vm1, %v749_v7, 0.0  ;;  %v779_v4 = vsel %vm771_vm1, %v769_v22, 0.0 }
 0x358   :  { %v773_v20 = vrot.slane %v772_v6, 4  ;;  %v780_v14 = vrot.slane %v779_v4, 4 }
 0x35a   :  { %v774_v58 = vadd.f32 %v773_v20, %v772_v6  ;;  %v781_v52 = vadd.f32 %v780_v14, %v779_v4  ;;  %v1166_v4 = vadd.f32 %v1165_v60, %v1164_v12  ;;  %v1141_v20 = vrot.slane %v1140_v56, 1 }
 0x35c   :  { %v775_v38 = vrot.slane %v774_v58, 2  ;;  %v782_v8 = vrot.slane %v781_v52, 2  ;;  %v2504_v26 = vpop.f32.mrf.mxu3  ;;  %v2506_v18 = vpop.f32.mrf.mxu2  ;;  %1621 = vrcp.f32 %v1166_v4 }
 0x35e   :  { %v776_v3 = vadd.f32 %v775_v38, %v774_v58  ;;  %v783_v31 = vadd.f32 %v782_v8, %v781_v52  ;;  %v1129_v52 = vrot.slane %v1128_v57, 1 }
 0x360   :  { %v777_v17 = vrot.slane %v776_v3, 1  ;;  %v784_v46 = vrot.slane %v783_v31, 1  ;;  %v1130_v61 = vadd.f32 %v1129_v52, %v1128_v57 }
 0x362   :  { %v778_v21 = vadd.f32 %v777_v17, %v776_v3  ;;  %v785_v19 = vadd.f32 %v784_v46, %v783_v31  ;;  %v1142_v3 = vadd.f32 %v1141_v20, %v1140_v56  ;;  %v1622_v37 = vpop.eup %1621 }
 0x364   :  { %v793_v48 = vmul.f32 %v2516_v11, %v778_v21  ;;  %v794_v44 = vmul.f32 %v2516_v11, %v785_v19  ;;  %v1263_v33 = vpop.f32.mrf.mxu3  ;;  %v1292_v2 = vpop.f32.mrf.mxu2 }
 0x365   :  { %v1293_v19 = vadd.f32 %v1292_v2, %v1263_v33  ;;  %v1182_v2 = vmul.f32 %v1622_v37, %v2500_v51 }
 0x366   :  { %v2523_v49 = vsub.f32 %v749_v7, %v793_v48  ;;  %v2525_v16 = vsub.f32 %v769_v22, %v794_v44  ;;  %v1153_v7 = vrot.slane %v1152_v29, 1  ;;  %v1290_v44 = vadd.f32 %v2506_v18, %v2504_v26 }
 0x367   :  { %v1302_v62 = vmul.f32 %v1293_v19, %v2423_v59 }
 0x368   :  { %v797_v42 = vmul.f32 %v2523_v49, %v2523_v49  ;;  %v798_v41 = vmul.f32 %v2525_v16, %v2525_v16  ;;  %v1154_v58 = vadd.f32 %v1153_v7, %v1152_v29 }
 0x36a   :  { %v799_v10 = vsel %vm771_vm1, %v797_v42, 0.0  ;;  %v806_v5 = vsel %vm771_vm1, %v798_v41, 0.0  ;;  %1623 = vrcp.f32 %v1154_v58 }
 0x36b   :  { %v800_v34 = vrot.slane %v799_v10, 4  ;;  %v807_v45 = vrot.slane %v806_v5, 4  ;;  %1625 = vrcp.f32 %v1142_v3 }
 0x36c   :  { %v1266_v36 = vpop.f32.mrf.mxu3  ;;  %v1295_v9 = vpop.f32.mrf.mxu2  ;;  %1627 = vrcp.f32 %v1130_v61 }
 0x36d   :  { %v801_v54 = vadd.f32 %v800_v34, %v799_v10  ;;  %v808_v32 = vadd.f32 %v807_v45, %v806_v5  ;;  %v1296_v17 = vadd.f32 %v1295_v9, %v1266_v36  ;;  %v2548_v45 = vpop.permute.xlu1 %841 }
 0x36f   :  { %v802_v22 = vrot.slane %v801_v54, 2  ;;  %v809_v6 = vrot.slane %v808_v32, 2  ;;  %v1303_v24 = vmul.f32 %v1296_v17, %v2415_v55 }
 0x370   :  { %v1624_v27 = vpop.eup %1623 }
 0x371   :  { %v803_v14 = vadd.f32 %v802_v22, %v801_v54  ;;  %v810_v39 = vadd.f32 %v809_v6, %v808_v32  ;;  %v1626_v33 = vpop.eup %1625  ;;  %v1180_v26 = vmul.f32 %v1624_v27, %v2502_v0 }
 0x372   :  { %v1628_v42 = vpop.eup %1627  ;;  %v1178_v12 = vmul.f32 %v1626_v33, %v2509_v43 }
 0x373   :  { %v804_v38 = vrot.slane %v803_v14, 1  ;;  %v811_v8 = vrot.slane %v810_v39, 1  ;;  %v1176_v10 = vmul.f32 %v1628_v42, %v2512_v15 }
 0x374   :  { %v1269_v63 = vpop.f32.mrf.mxu3  ;;  %v1298_v50 = vpop.f32.mrf.mxu2 }
 0x375   :  { %v805_v31 = vadd.f32 %v804_v38, %v803_v14  ;;  %v812_v47 = vadd.f32 %v811_v8, %v810_v39  ;;  %v1299_v46 = vadd.f32 %v1298_v50, %v1269_v63 }
 0x377   :  { %v813_v30 = vmul.f32 %v805_v31, %v2516_v11  ;;  %v814_v21 = vmul.f32 %v812_v47, %v2516_v11  ;;  %v1304_v13 = vmul.f32 %v1299_v46, %v2408_v23  ;;  %v1301_v23 = vmul.f32 %v1290_v44, %v2431_v40 }
 0x379   :  { %v815_v53 = vadd.f32 1e-05, %v813_v30  ;;  %v816_v48 = vadd.f32 1e-05, %v814_v21  ;;  %1317 = vmatpush.msrb.mxu0 %v1304_v13 }
 0x37b   :  { %1629 = vrsqrt.f32 %v815_v53  ;;  %1318 = vmatpush.msrb.mxu0 %v1303_v24  ;;  %vm823_vm5 = vweird.f32 %v815_v53  ;;  %vm833_vm7 = vweird.f32 %v816_v48 }
 0x37c   :  { %1631 = vrsqrt.f32 %v816_v48 }
 0x37d   :  { %1319 = vmatpush.msrb.mxu0 %v1302_v62 }
 0x37f   :  { %1320 = vmatpush.msrb.mxu0 %v1301_v23 }
 0x380   :  { %1459 = vmatmul.msk.f32.vlgmr.msrb.gmra.mxu0 %vm699_vm0, %v2441_v28 }
 0x381   :  { %v1630_v55 = vpop.eup %1629  ;;  %1360 = vmatpush.msra.mxu0 %v1182_v2 }
 0x382   :  { %v1632_v18 = vpop.eup %1631  ;;  %v818_v41 = vmul.f32 %v1630_v55, %v815_v53  ;;  %vm824_vm3 = vweird.f32 %v1630_v55 }
 0x383   :  { %v828_v59 = vmul.f32 %v1632_v18, %v816_v48  ;;  %1361 = vmatpush.msra.mxu0 %v1180_v26  ;;  %vm834_vm4 = vweird.f32 %v1632_v18  ;;  %vm825_vm6 = vmor %vm823_vm5, %vm824_vm3 }
 0x384   :  { %v819_v25 = vmul.f32 %v1630_v55, %v818_v41  ;;  %vm835_vm8 = vmor %vm833_vm7, %vm834_vm4 }
 0x385   :  { %v829_v40 = vmul.f32 %v1632_v18, %v828_v59  ;;  %1362 = vmatpush.msra.mxu0 %v1178_v12 }
 0x386   :  { %v820_v51 = vmul.f32 0.5, %v819_v25 }
 0x387   :  { %v830_v5 = vmul.f32 0.5, %v829_v40  ;;  %1363 = vmatpush.msra.mxu0 %v1176_v10 }
 0x388   :  { %v821_v29 = vsub.f32 1.5, %v820_v51 }
 0x389   :  { %v831_v28 = vsub.f32 1.5, %v830_v5 }
 0x38a   :  { %v822_v1 = vmul.f32 %v1630_v55, %v821_v29 }
 0x38b   :  { %v832_v0 = vmul.f32 %v1632_v18, %v831_v28 }
 0x38c   :  { %v826_v34 = vsel %vm825_vm6, %v1630_v55, %v822_v1 }
 0x38d   :  { %v836_v43 = vsel %vm835_vm8, %v1632_v18, %v832_v0  ;;  %v837_v36 = vmul.f32 %v826_v34, %v2523_v49 }
 0x38e   :  { %v838_v15 = vmul.f32 %v836_v43, %v2525_v16 }
 0x38f   :  { %v844_v60 = vmul.f32 %v2548_v45, %v837_v36 }
 0x390   :  { %v845_v9 = vmul.f32 %v2548_v45, %v838_v15 }
 0x392   :  { %v848_v56 = vrot.slane %v845_v9, 4 }
 0x394   :  { %v849_v54 = vsel %vm771_vm1, %v844_v60, %v848_v56 }
 0x395   :  { %851 = vst [vmem:[#allocation2] sm:$0xff] %v849_v54 }
 0x3fd   :  { %v1322_v32 = vpop.f32.mrf.mxu0 }
 0x3fe   :  { %1460 = vmatmul.msk.f32.vlgmr.msrb.gmra.mxu1 %vm699_vm0, %v1322_v32  ;;  %1461 = vmatmul.msk.f32.vlgmr.msra.gmra.mxu0 %vm699_vm0, %v1322_v32 }
 0x47b   :  { %v1345_v7 = vpop.f32.mrf.mxu1  ;;  %v1365_v57 = vpop.f32.mrf.mxu0 }
 0x47c   :  { %v1346_v22 = vadd.f32 %v1345_v7, %v2494_v35  ;;  %v1366_v49 = vadd.f32 %v1365_v57, %v2494_v35 }
 0x47e   :  { %v1368_v16 = vsel %vm771_vm1, %v1346_v22, 0.0  ;;  %v1375_v6 = vsel %vm771_vm1, %v1366_v49, 0.0 }
 0x47f   :  { %v1369_v4 = vrot.slane %v1368_v16, 4  ;;  %v1376_v20 = vrot.slane %v1375_v6, 4 }
 0x481   :  { %v1370_v14 = vadd.f32 %v1369_v4, %v1368_v16  ;;  %v1377_v39 = vadd.f32 %v1376_v20, %v1375_v6 }
 0x483   :  { %v1371_v58 = vrot.slane %v1370_v14, 2  ;;  %v1378_v52 = vrot.slane %v1377_v39, 2 }
 0x485   :  { %v1372_v38 = vadd.f32 %v1371_v58, %v1370_v14  ;;  %v1379_v8 = vadd.f32 %v1378_v52, %v1377_v39 }
 0x487   :  { %v1373_v63 = vrot.slane %v1372_v38, 1  ;;  %v1380_v50 = vrot.slane %v1379_v8, 1 }
 0x489   :  { %v1374_v3 = vadd.f32 %v1373_v63, %v1372_v38  ;;  %v1381_v31 = vadd.f32 %v1380_v50, %v1379_v8 }
 0x48b   :  { %v1382_v47 = vmul.f32 %v1374_v3, %v2516_v11  ;;  %v1383_v35 = vmul.f32 %v1381_v31, %v2516_v11 }
 0x48d   :  { %v1384_v17 = vsub.f32 %v1346_v22, %v1382_v47  ;;  %v1385_v46 = vsub.f32 %v1366_v49, %v1383_v35 }
 0x48f   :  { %v1386_v61 = vmul.f32 %v1384_v17, %v1384_v17  ;;  %v1387_v30 = vmul.f32 %v1385_v46, %v1385_v46 }
 0x491   :  { %v1388_v21 = vsel %vm771_vm1, %v1386_v61, 0.0  ;;  %v1395_v19 = vsel %vm771_vm1, %v1387_v30, 0.0 }
 0x492   :  { %v1389_v13 = vrot.slane %v1388_v21, 4  ;;  %v1396_v53 = vrot.slane %v1395_v19, 4 }
 0x494   :  { %v1390_v48 = vadd.f32 %v1389_v13, %v1388_v21  ;;  %v1397_v44 = vadd.f32 %v1396_v53, %v1395_v19 }
 0x496   :  { %v1391_v24 = vrot.slane %v1390_v48, 2  ;;  %v1398_v37 = vrot.slane %v1397_v44, 2 }
 0x498   :  { %v1392_v62 = vadd.f32 %v1391_v24, %v1390_v48  ;;  %v1399_v27 = vadd.f32 %v1398_v37, %v1397_v44 }
 0x49a   :  { %v1393_v23 = vrot.slane %v1392_v62, 1  ;;  %v1400_v33 = vrot.slane %v1399_v27, 1 }
 0x49c   :  { %v1394_v2 = vadd.f32 %v1393_v23, %v1392_v62  ;;  %v1401_v42 = vadd.f32 %v1400_v33, %v1399_v27 }
 0x49e   :  { %v1402_v55 = vmul.f32 %v1394_v2, %v2516_v11  ;;  %v1403_v26 = vmul.f32 %v1401_v42, %v2516_v11 }
 0x4a0   :  { %v1404_v18 = vadd.f32 1e-05, %v1402_v55  ;;  %v1405_v41 = vadd.f32 1e-05, %v1403_v26 }
 0x4a2   :  { %1633 = vrsqrt.f32 %v1404_v18  ;;  %vm1412_vm11 = vweird.f32 %v1404_v18  ;;  %vm1422_vm13 = vweird.f32 %v1405_v41 }
 0x4a3   :  { %1635 = vrsqrt.f32 %v1405_v41 }
 0x4a8   :  { %v1634_v59 = vpop.eup %1633 }
 0x4a9   :  { %v1636_v12 = vpop.eup %1635  ;;  %v1407_v25 = vmul.f32 %v1634_v59, %v1404_v18  ;;  %vm1413_vm9 = vweird.f32 %v1634_v59 }
 0x4aa   :  { %v1417_v40 = vmul.f32 %v1636_v12, %v1405_v41  ;;  %vm1423_vm10 = vweird.f32 %v1636_v12  ;;  %vm1414_vm12 = vmor %vm1412_vm11, %vm1413_vm9 }
 0x4ab   :  { %v1408_v10 = vmul.f32 %v1634_v59, %v1407_v25  ;;  %vm1424_vm14 = vmor %vm1422_vm13, %vm1423_vm10 }
 0x4ac   :  { %v1418_v51 = vmul.f32 %v1636_v12, %v1417_v40 }
 0x4ad   :  { %v1409_v5 = vmul.f32 0.5, %v1408_v10 }
 0x4ae   :  { %v1419_v29 = vmul.f32 0.5, %v1418_v51 }
 0x4af   :  { %v1410_v28 = vsub.f32 1.5, %v1409_v5 }
 0x4b0   :  { %v1420_v1 = vsub.f32 1.5, %v1419_v29 }
 0x4b1   :  { %v1411_v0 = vmul.f32 %v1634_v59, %v1410_v28 }
 0x4b2   :  { %v1421_v11 = vmul.f32 %v1636_v12, %v1420_v1 }
 0x4b3   :  { %v1415_v34 = vsel %vm1414_vm12, %v1634_v59, %v1411_v0 }
 0x4b4   :  { %v1425_v43 = vsel %vm1424_vm14, %v1636_v12, %v1421_v11  ;;  %v1426_v36 = vmul.f32 %v1415_v34, %v1384_v17 }
 0x4b5   :  { %v1427_v15 = vmul.f32 %v1425_v43, %v1385_v46 }
 0x4b6   :  { %v1428_v60 = vmul.f32 %v1426_v36, %v2548_v45 }
 0x4b7   :  { %v1429_v9 = vmul.f32 %v1427_v15, %v2548_v45 }
 0x4b9   :  { %v1432_v56 = vrot.slane %v1429_v9, 4 }
 0x4bb   :  { %v1433_v54 = vsel %vm771_vm1, %v1428_v60, %v1432_v56 }
 0x4bc   :  { %1436 = vst [vmem:[#allocation2 + $0x8] sm:$0xff] %v1433_v54 }
 0x4bd   :  { %1449 = dma.vmem_to_hbm [thread:$0]  %s1442_s5, 256, %s1444_s0, [#allocation3], %s1669_s13, %s1669_s13, %s1670_s14  }
 0x4be   :  { %1661 = dma.done.wait [#allocation3], 256  }
 0x4bf   :  { %1662 = vsyncadd [#allocation3], 4294967040 }
 0x4c0   :  { %1454 = vsyncpa [#allocation3], 1 }

</bundles_post_ra>
